<compile_context>
chip_gen: v5e
topology: v5e:2x2
jax: 0.10.0
libtpu: 0.0.40
codegen_flags: <defaults>
</compile_context>

<pallas_src>
import jax
import jax.numpy as jnp
from jax.experimental import pallas as pl
from jax.experimental.pallas import tpu as pltpu


# ---------------------------------------------------------------------------
# Weight folding:  conv3x3(nearest_up2(x)) == 4 sub-pixel 2x2 convs on x.
#
# With Xp = x zero-padded by 1 px, output pixel (2r+dr, 2c+dc) equals
#     sum_{a,b in {0,1}}  Weff[dr,dc,a,b] . Xp[r+dr+a, c+dc+b]
# where Weff[dr,dc,a,b] = sum_{kh in S(dr,a)} sum_{kw in S(dc,b)} w[kh,kw]
# and   S(0,0)={0}, S(0,1)={1,2}, S(1,0)={0,1}, S(1,1)={2}.
# ---------------------------------------------------------------------------
_S = {(0, 0): (0,), (0, 1): (1, 2), (1, 0): (0, 1), (1, 1): (2,)}


def _fold_upsample_into_weights(w_hwio):
    """(3, 3, Cin, Cout) HWIO -> (16, Cin, Cout); index ((dr*2+dc)*2+a)*2+b."""
    taps = []
    for dr in range(2):
        for dc in range(2):
            for a in range(2):
                for b in range(2):
                    taps.append(sum(w_hwio[kh, kw]
                                    for kh in _S[(dr, a)]
                                    for kw in _S[(dc, b)]))
    return jnp.stack(taps, axis=0)


# ---------------------------------------------------------------------------
# Pallas kernel: one (frame, row-tile) step of conv3x3(up2(x)) + bias.
#   x_ref : (1, THq, W+2, Cin)   bf16  padded-input rows [t*THq, (t+1)*THq)
#   xh_ref: (1, THq, W+2, Cin)   bf16  next row block (only first 2 rows = halo)
#   w_ref : (16, Cin, Cout)      bf16  folded upsample+conv weights
#   b_ref : (1, Cout)            f32   bias
#   o_ref : (2*THq, W, 2*Cout)   f32   output rows [2*t*THq, 2*(t+1)*THq),
#                                      even/odd output cols packed on lane axis
# ---------------------------------------------------------------------------
def _upsample_conv3x3_kernel(x_ref, xh_ref, w_ref, b_ref, o_ref):
    thq = x_ref.shape[1]
    cin = x_ref.shape[3]
    w_out = o_ref.shape[1]
    cout = w_ref.shape[2]

    # (THq+2, W+2, Cin) halo window; concat along the leading axis is cheap.
    win = jnp.concatenate([x_ref[0], xh_ref[0, :2]], axis=0)
    bias = b_ref[...].astype(jnp.float32)                       # (1, Cout)

    dr_slabs = []
    for dr in range(2):                                         # even/odd out rows
        dc_slabs = []
        for dc in range(2):                                     # even/odd out cols
            acc = jnp.zeros((thq * w_out, cout), jnp.float32)
            for a in range(2):
                for b in range(2):
                    # Static row/col shifted view; rows are a free leading-dim
                    # slice, col shift is a small static sublane slice.
                    tap = win[dr + a:dr + a + thq, dc + b:dc + b + w_out, :]
                    w_tap = w_ref[((dr * 2 + dc) * 2 + a) * 2 + b]
                    acc = acc + jnp.dot(tap.reshape(thq * w_out, cin), w_tap,
                                        preferred_element_type=jnp.float32)
            dc_slabs.append((acc + bias).reshape(thq, w_out, cout))
        # Even/odd output columns side by side on the lane axis; unpacked to
        # (..., 2W, Cout) by a free contiguous reshape outside the kernel.
        dr_slabs.append(jnp.concatenate(dc_slabs, axis=-1))     # (THq, W, 2*Cout)
    # Interleave even/odd output rows; merging leading dims is layout-free.
    tile = jnp.stack(dr_slabs, axis=1).reshape(2 * thq, w_out, 2 * cout)
    o_ref[...] = tile.astype(o_ref.dtype)


def _pick_row_tile(h, w, cin, cout, max_rows, budget_bytes=24 << 20):
    """Largest divisor of h (2..max_rows) whose working set fits the budget."""
    divisors = [d for d in range(2, min(h, max_rows) + 1) if h % d == 0]
    if not divisors:
        return h                                   # prime/tiny H: whole frame

    def vmem_use(d):
        in_blk = d * (w + 2) * cin * 2             # bf16 input block
        out_blk = (2 * d) * w * (2 * cout) * 4     # f32 output block
        return 4 * in_blk + 2 * out_blk            # 2 halo specs + output, x2 buffers

    fitting = [d for d in divisors if vmem_use(d) <= budget_bytes]
    return max(fitting) if fitting else min(divisors)


def upsample_conv3x3_pallas(frames, w_hwio, bias, *, max_tile_rows=64):
    """conv3x3(pad1(nearest_up2(frames))) for NHWC frames.

    frames: (N, H, W, Cin) float32 at pre-upsample resolution.
    Returns (N, 2H, 2W, Cout) float32.
    """
    n, h, w, cin = frames.shape
    cout = w_hwio.shape[-1]
    assert h >= 2, "need at least 2 input rows"
    out_dtype = frames.dtype

    thq = _pick_row_tile(h, w, cin, cout, max_tile_rows)   # input rows per tile
    n_tiles = h // thq

    # 1-px zero pad of the *pre-upsample* tensor (top/left/right) plus enough
    # bottom zero rows that the halo BlockSpec never indexes a partial block.
    xp = jnp.pad(frames.astype(jnp.bfloat16),
                 ((0, 0), (1, thq - 1), (1, 1), (0, 0)))
    w_eff = _fold_upsample_into_weights(w_hwio).astype(jnp.bfloat16)
    bias2d = bias.reshape(1, cout).astype(jnp.float32)

    out = pl.pallas_call(
        _upsample_conv3x3_kernel,
        out_shape=jax.ShapeDtypeStruct((n * 2 * h, w, 2 * cout), out_dtype),
        grid=(n, n_tiles),
        in_specs=[
            # main row block + its 2-row halo (next block of the same array).
            pl.BlockSpec((1, thq, w + 2, cin), lambda i, t: (i, t, 0, 0)),
            pl.BlockSpec((1, thq, w + 2, cin), lambda i, t: (i, t + 1, 0, 0)),
            # folded weights / bias: constant index map -> no per-step re-DMA.
            # TODO(synk): drop the redundant second weight buffer via
            # pipeline_mode once pl.Buffered(1) is stable.
            pl.BlockSpec((16, cin, cout), lambda i, t: (0, 0, 0)),
            pl.BlockSpec((1, cout), lambda i, t: (0, 0)),
        ],
        out_specs=pl.BlockSpec((2 * thq, w, 2 * cout),
                               lambda i, t: (i * n_tiles + t, 0, 0)),
        compiler_params=pltpu.CompilerParams(
            # Independent steps: both axes parallel (megacore split on v7x).
            dimension_semantics=("parallel", "parallel"),
            vmem_limit_bytes=48 * 1024 * 1024,
        ),
    )(xp, xp, w_eff, bias2d)

    # (N*2H, W, 2*Cout) -> (N, 2H, 2W, Cout): contiguous, layout-free reshape.
    return out.reshape(n, 2 * h, 2 * w, cout)


# ---------------------------------------------------------------------------
# Full forward pass (matches CogVideoXUpsample3D.forward).
# ---------------------------------------------------------------------------
def cogvideox_upsample3d_forward(inputs, w_hwio, bias, compress_time=False,
                                 max_tile_rows=64):
    """inputs: (B, C, T, H, W) float32; returns (B, Cout, T', 2H, 2W)."""
    b, c, t, h, w = inputs.shape

    if compress_time:
        if t > 1 and t % 2 == 1:
            # first frame: spatial-only; remaining frames: temporal x2 as well.
            inputs = jnp.concatenate(
                [inputs[:, :, :1], jnp.repeat(inputs[:, :, 1:], 2, axis=2)],
                axis=2)
        elif t > 1:
            inputs = jnp.repeat(inputs, 2, axis=2)
        else:
            # TODO(synk): stateful `self.cached_inputs` path (concat previous
            # call's last frame) has no functional equivalent; this implements
            # the first-call (cached_inputs is None) behaviour.
            inputs = jnp.repeat(inputs, 2, axis=2)
    # The spatial 2x upsample is fused into the Pallas conv kernel.

    tn = inputs.shape[2]
    # NCTHW -> (B*T, H, W, C) at *pre-upsample* resolution (4x cheaper than
    # transposing the upsampled tensor).
    frames = jnp.transpose(inputs, (0, 2, 3, 4, 1)).reshape(b * tn, h, w, c)
    out = upsample_conv3x3_pallas(frames, w_hwio, bias,
                                  max_tile_rows=max_tile_rows)
    cout = w_hwio.shape[-1]
    # TODO(synk): keeping the module boundary channels-last would remove this
    # final full-size NHWC -> NCHW transpose.
    return out.reshape(b, tn, 2 * h, 2 * w, cout).transpose(0, 4, 1, 2, 3)


# ---------------------------------------------------------------------------
# Pure-JAX reference (lax conv on the explicitly upsampled tensor).
# ---------------------------------------------------------------------------
def _reference_forward(x, w_oihw, bias, compress_time=False):
    b, c, t, h, w = x.shape
    if compress_time:
        if t > 1 and t % 2 == 1:
            x = jnp.concatenate(
                [x[:, :, :1], jnp.repeat(x[:, :, 1:], 2, axis=2)], axis=2)
        else:
            x = jnp.repeat(x, 2, axis=2)
    tn = x.shape[2]
    up = jnp.repeat(jnp.repeat(x, 2, axis=3), 2, axis=4)
    frames = jnp.transpose(up, (0, 2, 1, 3, 4)).reshape(b * tn, c, 2 * h, 2 * w)
    y = jax.lax.conv_general_dilated(
        frames, w_oihw, window_strides=(1, 1), padding=((1, 1), (1, 1)),
        dimension_numbers=("NCHW", "OIHW", "NCHW")) + bias[None, :, None, None]
    cout = w_oihw.shape[0]
    return y.reshape(b, tn, cout, 2 * h, 2 * w).transpose(0, 2, 1, 3, 4)


if __name__ == "__main__":
    key = jax.random.PRNGKey(0)
    k_x, k_w, k_b = jax.random.split(key, 3)

    B, Cin, T, H, W = 2, 4, 3, 16, 16
    Cout = 8

    x = jax.random.normal(k_x, (B, Cin, T, H, W), dtype=jnp.float32)
    w_oihw = 0.1 * jax.random.normal(k_w, (Cout, Cin, 3, 3), dtype=jnp.float32)
    bias = 0.1 * jax.random.normal(k_b, (Cout,), dtype=jnp.float32)
    w_hwio = jnp.transpose(w_oihw, (2, 3, 1, 0))          # (3, 3, Cin, Cout)

    fwd = jax.jit(cogvideox_upsample3d_forward,
                  static_argnames=("compress_time", "max_tile_rows"))

    # max_tile_rows=8 -> 2 row tiles per frame: exercises the halo/tiling path.
    out = jax.block_until_ready(
        fwd(x, w_hwio, bias, compress_time=False, max_tile_rows=8))
    ref = _reference_forward(x, w_oihw, bias, compress_time=False)
    assert out.shape == (B, Cout, T, 2 * H, 2 * W), out.shape
    # Tolerance accounts for bf16 MXU operands (f32 accumulation).
    assert jnp.allclose(out, ref, atol=3e-2, rtol=3e-2), (
        float(jnp.max(jnp.abs(out - ref))))

    out_ct = jax.block_until_ready(
        fwd(x, w_hwio, bias, compress_time=True, max_tile_rows=8))
    ref_ct = _reference_forward(x, w_oihw, bias, compress_time=True)
    assert out_ct.shape == (B, Cout, 1 + 2 * (T - 1), 2 * H, 2 * W), out_ct.shape
    assert jnp.allclose(out_ct, ref_ct, atol=3e-2, rtol=3e-2), (
        float(jnp.max(jnp.abs(out_ct - ref_ct))))

    print("KERNEL_OK")
</pallas_src>

<mosaic_0001>
module attributes {stable_mosaic.version = 11 : i64} {
  func.func @_upsample_conv3x3_kernel(%arg0: i32, %arg1: i32, %arg2: memref<1x8x18x4xbf16, #tpu.memory_space<vmem>>, %arg3: memref<1x8x18x4xbf16, #tpu.memory_space<vmem>>, %arg4: memref<16x4x8xbf16, #tpu.memory_space<vmem>>, %arg5: memref<1x8xf32, #tpu.memory_space<vmem>>, %arg6: memref<16x16x16xf32, #tpu.memory_space<vmem>>) attributes {dimension_semantics = [#tpu.dimension_semantics<parallel>, #tpu.dimension_semantics<parallel>], iteration_bounds = array<i64: 6, 2>, scalar_prefetch = 0 : i64, scratch_operands = 0 : i64, tpu.core_type = #tpu.core_type<tc>, window_params = [{transform_indices = @transform_0, window_bounds = array<i64: 1, 8, 18, 4>}, {transform_indices = @transform_1, window_bounds = array<i64: 1, 8, 18, 4>}, {pipeline_mode = #tpu.pipeline_mode<synchronous>, transform_indices = @transform_2, window_bounds = array<i64: 16, 4, 8>}, {pipeline_mode = #tpu.pipeline_mode<synchronous>, transform_indices = @transform_3, window_bounds = array<i64: 1, 8>}, {transform_indices = @transform_4, window_bounds = array<i64: 16, 16, 16>}]} {
    %c0 = arith.constant 0 : index
    %c0_0 = arith.constant 0 : index
    %c0_1 = arith.constant 0 : index
    %c0_2 = arith.constant 0 : index
    %0 = vector.load %arg2[%c0, %c0_0, %c0_1, %c0_2] : memref<1x8x18x4xbf16, #tpu.memory_space<vmem>>, vector<1x8x18x4xbf16>
    %1 = vector.shape_cast %0 : vector<1x8x18x4xbf16> to vector<8x18x4xbf16>
    %c0_3 = arith.constant 0 : index
    %c0_4 = arith.constant 0 : index
    %c0_5 = arith.constant 0 : index
    %c0_6 = arith.constant 0 : index
    %2 = vector.load %arg3[%c0_3, %c0_4, %c0_5, %c0_6] : memref<1x8x18x4xbf16, #tpu.memory_space<vmem>>, vector<1x2x18x4xbf16>
    %3 = vector.shape_cast %2 : vector<1x2x18x4xbf16> to vector<2x18x4xbf16>
    %4 = tpu.concatenate %1, %3 in 0 : vector<8x18x4xbf16>, vector<2x18x4xbf16> -> vector<10x18x4xbf16>
    %c0_7 = arith.constant 0 : index
    %c0_8 = arith.constant 0 : index
    %5 = vector.load %arg5[%c0_7, %c0_8] : memref<1x8xf32, #tpu.memory_space<vmem>>, vector<1x8xf32>
    %cst = arith.constant 0.000000e+00 : f32
    %6 = vector.broadcast %cst : f32 to vector<128x8xf32>
    %7 = vector.extract_strided_slice %4 {offsets = [0, 0, 0], sizes = [8, 16, 4], strides = [1, 1, 1]} : vector<10x18x4xbf16> to vector<8x16x4xbf16>
    %c0_9 = arith.constant 0 : index
    %c0_10 = arith.constant 0 : index
    %c0_11 = arith.constant 0 : index
    %8 = vector.load %arg4[%c0_9, %c0_10, %c0_11] : memref<16x4x8xbf16, #tpu.memory_space<vmem>>, vector<1x4x8xbf16>
    %9 = vector.shape_cast %8 : vector<1x4x8xbf16> to vector<4x8xbf16>
    %10 = vector.shape_cast %7 : vector<8x16x4xbf16> to vector<128x4xbf16>
    %cst_12 = arith.constant dense<0.000000e+00> : vector<128x8xf32>
    %11 = tpu.matmul %10, %9, %cst_12 {dimension_numbers = #tpu.dot_dimension_numbers<[1], [0], [0], [1], [0, 0, 1, 1], [], []>} : vector<128x4xbf16>, vector<4x8xbf16>, vector<128x8xf32> -> vector<128x8xf32>
    %12 = arith.addf %6, %11 : vector<128x8xf32>
    %13 = vector.extract_strided_slice %4 {offsets = [0, 1, 0], sizes = [8, 16, 4], strides = [1, 1, 1]} : vector<10x18x4xbf16> to vector<8x16x4xbf16>
    %c1 = arith.constant 1 : index
    %c0_13 = arith.constant 0 : index
    %c0_14 = arith.constant 0 : index
    %14 = vector.load %arg4[%c1, %c0_13, %c0_14] : memref<16x4x8xbf16, #tpu.memory_space<vmem>>, vector<1x4x8xbf16>
    %15 = vector.shape_cast %14 : vector<1x4x8xbf16> to vector<4x8xbf16>
    %16 = vector.shape_cast %13 : vector<8x16x4xbf16> to vector<128x4xbf16>
    %cst_15 = arith.constant dense<0.000000e+00> : vector<128x8xf32>
    %17 = tpu.matmul %16, %15, %cst_15 {dimension_numbers = #tpu.dot_dimension_numbers<[1], [0], [0], [1], [0, 0, 1, 1], [], []>} : vector<128x4xbf16>, vector<4x8xbf16>, vector<128x8xf32> -> vector<128x8xf32>
    %18 = arith.addf %12, %17 : vector<128x8xf32>
    %19 = vector.extract_strided_slice %4 {offsets = [1, 0, 0], sizes = [8, 16, 4], strides = [1, 1, 1]} : vector<10x18x4xbf16> to vector<8x16x4xbf16>
    %c2 = arith.constant 2 : index
    %c0_16 = arith.constant 0 : index
    %c0_17 = arith.constant 0 : index
    %20 = vector.load %arg4[%c2, %c0_16, %c0_17] : memref<16x4x8xbf16, #tpu.memory_space<vmem>>, vector<1x4x8xbf16>
    %21 = vector.shape_cast %20 : vector<1x4x8xbf16> to vector<4x8xbf16>
    %22 = vector.shape_cast %19 : vector<8x16x4xbf16> to vector<128x4xbf16>
    %cst_18 = arith.constant dense<0.000000e+00> : vector<128x8xf32>
    %23 = tpu.matmul %22, %21, %cst_18 {dimension_numbers = #tpu.dot_dimension_numbers<[1], [0], [0], [1], [0, 0, 1, 1], [], []>} : vector<128x4xbf16>, vector<4x8xbf16>, vector<128x8xf32> -> vector<128x8xf32>
    %24 = arith.addf %18, %23 : vector<128x8xf32>
    %25 = vector.extract_strided_slice %4 {offsets = [1, 1, 0], sizes = [8, 16, 4], strides = [1, 1, 1]} : vector<10x18x4xbf16> to vector<8x16x4xbf16>
    %c3 = arith.constant 3 : index
    %c0_19 = arith.constant 0 : index
    %c0_20 = arith.constant 0 : index
    %26 = vector.load %arg4[%c3, %c0_19, %c0_20] : memref<16x4x8xbf16, #tpu.memory_space<vmem>>, vector<1x4x8xbf16>
    %27 = vector.shape_cast %26 : vector<1x4x8xbf16> to vector<4x8xbf16>
    %28 = vector.shape_cast %25 : vector<8x16x4xbf16> to vector<128x4xbf16>
    %cst_21 = arith.constant dense<0.000000e+00> : vector<128x8xf32>
    %29 = tpu.matmul %28, %27, %cst_21 {dimension_numbers = #tpu.dot_dimension_numbers<[1], [0], [0], [1], [0, 0, 1, 1], [], []>} : vector<128x4xbf16>, vector<4x8xbf16>, vector<128x8xf32> -> vector<128x8xf32>
    %30 = arith.addf %24, %29 : vector<128x8xf32>
    %31 = vector.broadcast %5 : vector<1x8xf32> to vector<128x8xf32>
    %32 = arith.addf %30, %31 : vector<128x8xf32>
    %33 = vector.shape_cast %32 : vector<128x8xf32> to vector<8x16x8xf32>
    %cst_22 = arith.constant 0.000000e+00 : f32
    %34 = vector.broadcast %cst_22 : f32 to vector<128x8xf32>
    %35 = vector.extract_strided_slice %4 {offsets = [0, 1, 0], sizes = [8, 16, 4], strides = [1, 1, 1]} : vector<10x18x4xbf16> to vector<8x16x4xbf16>
    %c4 = arith.constant 4 : index
    %c0_23 = arith.constant 0 : index
    %c0_24 = arith.constant 0 : index
    %36 = vector.load %arg4[%c4, %c0_23, %c0_24] : memref<16x4x8xbf16, #tpu.memory_space<vmem>>, vector<1x4x8xbf16>
    %37 = vector.shape_cast %36 : vector<1x4x8xbf16> to vector<4x8xbf16>
    %38 = vector.shape_cast %35 : vector<8x16x4xbf16> to vector<128x4xbf16>
    %cst_25 = arith.constant dense<0.000000e+00> : vector<128x8xf32>
    %39 = tpu.matmul %38, %37, %cst_25 {dimension_numbers = #tpu.dot_dimension_numbers<[1], [0], [0], [1], [0, 0, 1, 1], [], []>} : vector<128x4xbf16>, vector<4x8xbf16>, vector<128x8xf32> -> vector<128x8xf32>
    %40 = arith.addf %34, %39 : vector<128x8xf32>
    %41 = vector.extract_strided_slice %4 {offsets = [0, 2, 0], sizes = [8, 16, 4], strides = [1, 1, 1]} : vector<10x18x4xbf16> to vector<8x16x4xbf16>
    %c5 = arith.constant 5 : index
    %c0_26 = arith.constant 0 : index
    %c0_27 = arith.constant 0 : index
    %42 = vector.load %arg4[%c5, %c0_26, %c0_27] : memref<16x4x8xbf16, #tpu.memory_space<vmem>>, vector<1x4x8xbf16>
    %43 = vector.shape_cast %42 : vector<1x4x8xbf16> to vector<4x8xbf16>
    %44 = vector.shape_cast %41 : vector<8x16x4xbf16> to vector<128x4xbf16>
    %cst_28 = arith.constant dense<0.000000e+00> : vector<128x8xf32>
    %45 = tpu.matmul %44, %43, %cst_28 {dimension_numbers = #tpu.dot_dimension_numbers<[1], [0], [0], [1], [0, 0, 1, 1], [], []>} : vector<128x4xbf16>, vector<4x8xbf16>, vector<128x8xf32> -> vector<128x8xf32>
    %46 = arith.addf %40, %45 : vector<128x8xf32>
    %47 = vector.extract_strided_slice %4 {offsets = [1, 1, 0], sizes = [8, 16, 4], strides = [1, 1, 1]} : vector<10x18x4xbf16> to vector<8x16x4xbf16>
    %c6 = arith.constant 6 : index
    %c0_29 = arith.constant 0 : index
    %c0_30 = arith.constant 0 : index
    %48 = vector.load %arg4[%c6, %c0_29, %c0_30] : memref<16x4x8xbf16, #tpu.memory_space<vmem>>, vector<1x4x8xbf16>
    %49 = vector.shape_cast %48 : vector<1x4x8xbf16> to vector<4x8xbf16>
    %50 = vector.shape_cast %47 : vector<8x16x4xbf16> to vector<128x4xbf16>
    %cst_31 = arith.constant dense<0.000000e+00> : vector<128x8xf32>
    %51 = tpu.matmul %50, %49, %cst_31 {dimension_numbers = #tpu.dot_dimension_numbers<[1], [0], [0], [1], [0, 0, 1, 1], [], []>} : vector<128x4xbf16>, vector<4x8xbf16>, vector<128x8xf32> -> vector<128x8xf32>
    %52 = arith.addf %46, %51 : vector<128x8xf32>
    %53 = vector.extract_strided_slice %4 {offsets = [1, 2, 0], sizes = [8, 16, 4], strides = [1, 1, 1]} : vector<10x18x4xbf16> to vector<8x16x4xbf16>
    %c7 = arith.constant 7 : index
    %c0_32 = arith.constant 0 : index
    %c0_33 = arith.constant 0 : index
    %54 = vector.load %arg4[%c7, %c0_32, %c0_33] : memref<16x4x8xbf16, #tpu.memory_space<vmem>>, vector<1x4x8xbf16>
    %55 = vector.shape_cast %54 : vector<1x4x8xbf16> to vector<4x8xbf16>
    %56 = vector.shape_cast %53 : vector<8x16x4xbf16> to vector<128x4xbf16>
    %cst_34 = arith.constant dense<0.000000e+00> : vector<128x8xf32>
    %57 = tpu.matmul %56, %55, %cst_34 {dimension_numbers = #tpu.dot_dimension_numbers<[1], [0], [0], [1], [0, 0, 1, 1], [], []>} : vector<128x4xbf16>, vector<4x8xbf16>, vector<128x8xf32> -> vector<128x8xf32>
    %58 = arith.addf %52, %57 : vector<128x8xf32>
    %59 = vector.broadcast %5 : vector<1x8xf32> to vector<128x8xf32>
    %60 = arith.addf %58, %59 : vector<128x8xf32>
    %61 = vector.shape_cast %60 : vector<128x8xf32> to vector<8x16x8xf32>
    %62 = tpu.concatenate %33, %61 in 2 : vector<8x16x8xf32>, vector<8x16x8xf32> -> vector<8x16x16xf32>
    %cst_35 = arith.constant 0.000000e+00 : f32
    %63 = vector.broadcast %cst_35 : f32 to vector<128x8xf32>
    %64 = vector.extract_strided_slice %4 {offsets = [1, 0, 0], sizes = [8, 16, 4], strides = [1, 1, 1]} : vector<10x18x4xbf16> to vector<8x16x4xbf16>
    %c8 = arith.constant 8 : index
    %c0_36 = arith.constant 0 : index
    %c0_37 = arith.constant 0 : index
    %65 = vector.load %arg4[%c8, %c0_36, %c0_37] : memref<16x4x8xbf16, #tpu.memory_space<vmem>>, vector<1x4x8xbf16>
    %66 = vector.shape_cast %65 : vector<1x4x8xbf16> to vector<4x8xbf16>
    %67 = vector.shape_cast %64 : vector<8x16x4xbf16> to vector<128x4xbf16>
    %cst_38 = arith.constant dense<0.000000e+00> : vector<128x8xf32>
    %68 = tpu.matmul %67, %66, %cst_38 {dimension_numbers = #tpu.dot_dimension_numbers<[1], [0], [0], [1], [0, 0, 1, 1], [], []>} : vector<128x4xbf16>, vector<4x8xbf16>, vector<128x8xf32> -> vector<128x8xf32>
    %69 = arith.addf %63, %68 : vector<128x8xf32>
    %70 = vector.extract_strided_slice %4 {offsets = [1, 1, 0], sizes = [8, 16, 4], strides = [1, 1, 1]} : vector<10x18x4xbf16> to vector<8x16x4xbf16>
    %c9 = arith.constant 9 : index
    %c0_39 = arith.constant 0 : index
    %c0_40 = arith.constant 0 : index
    %71 = vector.load %arg4[%c9, %c0_39, %c0_40] : memref<16x4x8xbf16, #tpu.memory_space<vmem>>, vector<1x4x8xbf16>
    %72 = vector.shape_cast %71 : vector<1x4x8xbf16> to vector<4x8xbf16>
    %73 = vector.shape_cast %70 : vector<8x16x4xbf16> to vector<128x4xbf16>
    %cst_41 = arith.constant dense<0.000000e+00> : vector<128x8xf32>
    %74 = tpu.matmul %73, %72, %cst_41 {dimension_numbers = #tpu.dot_dimension_numbers<[1], [0], [0], [1], [0, 0, 1, 1], [], []>} : vector<128x4xbf16>, vector<4x8xbf16>, vector<128x8xf32> -> vector<128x8xf32>
    %75 = arith.addf %69, %74 : vector<128x8xf32>
    %76 = vector.extract_strided_slice %4 {offsets = [2, 0, 0], sizes = [8, 16, 4], strides = [1, 1, 1]} : vector<10x18x4xbf16> to vector<8x16x4xbf16>
    %c10 = arith.constant 10 : index
    %c0_42 = arith.constant 0 : index
    %c0_43 = arith.constant 0 : index
    %77 = vector.load %arg4[%c10, %c0_42, %c0_43] : memref<16x4x8xbf16, #tpu.memory_space<vmem>>, vector<1x4x8xbf16>
    %78 = vector.shape_cast %77 : vector<1x4x8xbf16> to vector<4x8xbf16>
    %79 = vector.shape_cast %76 : vector<8x16x4xbf16> to vector<128x4xbf16>
    %cst_44 = arith.constant dense<0.000000e+00> : vector<128x8xf32>
    %80 = tpu.matmul %79, %78, %cst_44 {dimension_numbers = #tpu.dot_dimension_numbers<[1], [0], [0], [1], [0, 0, 1, 1], [], []>} : vector<128x4xbf16>, vector<4x8xbf16>, vector<128x8xf32> -> vector<128x8xf32>
    %81 = arith.addf %75, %80 : vector<128x8xf32>
    %82 = vector.extract_strided_slice %4 {offsets = [2, 1, 0], sizes = [8, 16, 4], strides = [1, 1, 1]} : vector<10x18x4xbf16> to vector<8x16x4xbf16>
    %c11 = arith.constant 11 : index
    %c0_45 = arith.constant 0 : index
    %c0_46 = arith.constant 0 : index
    %83 = vector.load %arg4[%c11, %c0_45, %c0_46] : memref<16x4x8xbf16, #tpu.memory_space<vmem>>, vector<1x4x8xbf16>
    %84 = vector.shape_cast %83 : vector<1x4x8xbf16> to vector<4x8xbf16>
    %85 = vector.shape_cast %82 : vector<8x16x4xbf16> to vector<128x4xbf16>
    %cst_47 = arith.constant dense<0.000000e+00> : vector<128x8xf32>
    %86 = tpu.matmul %85, %84, %cst_47 {dimension_numbers = #tpu.dot_dimension_numbers<[1], [0], [0], [1], [0, 0, 1, 1], [], []>} : vector<128x4xbf16>, vector<4x8xbf16>, vector<128x8xf32> -> vector<128x8xf32>
    %87 = arith.addf %81, %86 : vector<128x8xf32>
    %88 = vector.broadcast %5 : vector<1x8xf32> to vector<128x8xf32>
    %89 = arith.addf %87, %88 : vector<128x8xf32>
    %90 = vector.shape_cast %89 : vector<128x8xf32> to vector<8x16x8xf32>
    %cst_48 = arith.constant 0.000000e+00 : f32
    %91 = vector.broadcast %cst_48 : f32 to vector<128x8xf32>
    %92 = vector.extract_strided_slice %4 {offsets = [1, 1, 0], sizes = [8, 16, 4], strides = [1, 1, 1]} : vector<10x18x4xbf16> to vector<8x16x4xbf16>
    %c12 = arith.constant 12 : index
    %c0_49 = arith.constant 0 : index
    %c0_50 = arith.constant 0 : index
    %93 = vector.load %arg4[%c12, %c0_49, %c0_50] : memref<16x4x8xbf16, #tpu.memory_space<vmem>>, vector<1x4x8xbf16>
    %94 = vector.shape_cast %93 : vector<1x4x8xbf16> to vector<4x8xbf16>
    %95 = vector.shape_cast %92 : vector<8x16x4xbf16> to vector<128x4xbf16>
    %cst_51 = arith.constant dense<0.000000e+00> : vector<128x8xf32>
    %96 = tpu.matmul %95, %94, %cst_51 {dimension_numbers = #tpu.dot_dimension_numbers<[1], [0], [0], [1], [0, 0, 1, 1], [], []>} : vector<128x4xbf16>, vector<4x8xbf16>, vector<128x8xf32> -> vector<128x8xf32>
    %97 = arith.addf %91, %96 : vector<128x8xf32>
    %98 = vector.extract_strided_slice %4 {offsets = [1, 2, 0], sizes = [8, 16, 4], strides = [1, 1, 1]} : vector<10x18x4xbf16> to vector<8x16x4xbf16>
    %c13 = arith.constant 13 : index
    %c0_52 = arith.constant 0 : index
    %c0_53 = arith.constant 0 : index
    %99 = vector.load %arg4[%c13, %c0_52, %c0_53] : memref<16x4x8xbf16, #tpu.memory_space<vmem>>, vector<1x4x8xbf16>
    %100 = vector.shape_cast %99 : vector<1x4x8xbf16> to vector<4x8xbf16>
    %101 = vector.shape_cast %98 : vector<8x16x4xbf16> to vector<128x4xbf16>
    %cst_54 = arith.constant dense<0.000000e+00> : vector<128x8xf32>
    %102 = tpu.matmul %101, %100, %cst_54 {dimension_numbers = #tpu.dot_dimension_numbers<[1], [0], [0], [1], [0, 0, 1, 1], [], []>} : vector<128x4xbf16>, vector<4x8xbf16>, vector<128x8xf32> -> vector<128x8xf32>
    %103 = arith.addf %97, %102 : vector<128x8xf32>
    %104 = vector.extract_strided_slice %4 {offsets = [2, 1, 0], sizes = [8, 16, 4], strides = [1, 1, 1]} : vector<10x18x4xbf16> to vector<8x16x4xbf16>
    %c14 = arith.constant 14 : index
    %c0_55 = arith.constant 0 : index
    %c0_56 = arith.constant 0 : index
    %105 = vector.load %arg4[%c14, %c0_55, %c0_56] : memref<16x4x8xbf16, #tpu.memory_space<vmem>>, vector<1x4x8xbf16>
    %106 = vector.shape_cast %105 : vector<1x4x8xbf16> to vector<4x8xbf16>
    %107 = vector.shape_cast %104 : vector<8x16x4xbf16> to vector<128x4xbf16>
    %cst_57 = arith.constant dense<0.000000e+00> : vector<128x8xf32>
    %108 = tpu.matmul %107, %106, %cst_57 {dimension_numbers = #tpu.dot_dimension_numbers<[1], [0], [0], [1], [0, 0, 1, 1], [], []>} : vector<128x4xbf16>, vector<4x8xbf16>, vector<128x8xf32> -> vector<128x8xf32>
    %109 = arith.addf %103, %108 : vector<128x8xf32>
    %110 = vector.extract_strided_slice %4 {offsets = [2, 2, 0], sizes = [8, 16, 4], strides = [1, 1, 1]} : vector<10x18x4xbf16> to vector<8x16x4xbf16>
    %c15 = arith.constant 15 : index
    %c0_58 = arith.constant 0 : index
    %c0_59 = arith.constant 0 : index
    %111 = vector.load %arg4[%c15, %c0_58, %c0_59] : memref<16x4x8xbf16, #tpu.memory_space<vmem>>, vector<1x4x8xbf16>
    %112 = vector.shape_cast %111 : vector<1x4x8xbf16> to vector<4x8xbf16>
    %113 = vector.shape_cast %110 : vector<8x16x4xbf16> to vector<128x4xbf16>
    %cst_60 = arith.constant dense<0.000000e+00> : vector<128x8xf32>
    %114 = tpu.matmul %113, %112, %cst_60 {dimension_numbers = #tpu.dot_dimension_numbers<[1], [0], [0], [1], [0, 0, 1, 1], [], []>} : vector<128x4xbf16>, vector<4x8xbf16>, vector<128x8xf32> -> vector<128x8xf32>
    %115 = arith.addf %109, %114 : vector<128x8xf32>
    %116 = vector.broadcast %5 : vector<1x8xf32> to vector<128x8xf32>
    %117 = arith.addf %115, %116 : vector<128x8xf32>
    %118 = vector.shape_cast %117 : vector<128x8xf32> to vector<8x16x8xf32>
    %119 = tpu.concatenate %90, %118 in 2 : vector<8x16x8xf32>, vector<8x16x8xf32> -> vector<8x16x16xf32>
    %120 = vector.shape_cast %62 : vector<8x16x16xf32> to vector<8x1x16x16xf32>
    %121 = vector.shape_cast %119 : vector<8x16x16xf32> to vector<8x1x16x16xf32>
    %122 = tpu.concatenate %120, %121 in 1 : vector<8x1x16x16xf32>, vector<8x1x16x16xf32> -> vector<8x2x16x16xf32>
    %123 = vector.shape_cast %122 : vector<8x2x16x16xf32> to vector<16x16x16xf32>
    %c0_61 = arith.constant 0 : index
    %c0_62 = arith.constant 0 : index
    %c0_63 = arith.constant 0 : index
    %124 = vector.load %arg6[%c0_61, %c0_62, %c0_63] : memref<16x16x16xf32, #tpu.memory_space<vmem>>, vector<16x16x16xf32>
    tpu.vector_store %arg6[%c0_61, %c0_62, %c0_63], %123 {strides = array<i32>} : memref<16x16x16xf32, #tpu.memory_space<vmem>>, vector<16x16x16xf32>,
    return
  }
  func.func @transform_0(%arg0: i32, %arg1: i32) -> (i32, i32, i32, i32) {
    %c0_i32 = arith.constant 0 : i32
    %c0_i32_0 = arith.constant 0 : i32
    %c0_i32_1 = arith.constant 0 : i32
    return %arg0, %arg1, %c0_i32, %c0_i32_0 : i32, i32, i32, i32
  }
  func.func @transform_1(%arg0: i32, %arg1: i32) -> (i32, i32, i32, i32) {
    %c1_i32 = arith.constant 1 : i32
    %0 = arith.addi %arg1, %c1_i32 : i32
    %c0_i32 = arith.constant 0 : i32
    %c0_i32_0 = arith.constant 0 : i32
    %c0_i32_1 = arith.constant 0 : i32
    return %arg0, %0, %c0_i32, %c0_i32_0 : i32, i32, i32, i32
  }
  func.func @transform_2(%arg0: i32, %arg1: i32) -> (i32, i32, i32) {
    %c0_i32 = arith.constant 0 : i32
    %c0_i32_0 = arith.constant 0 : i32
    %c0_i32_1 = arith.constant 0 : i32
    %c0_i32_2 = arith.constant 0 : i32
    return %c0_i32, %c0_i32_0, %c0_i32_1 : i32, i32, i32
  }
  func.func @transform_3(%arg0: i32, %arg1: i32) -> (i32, i32) {
    %c0_i32 = arith.constant 0 : i32
    %c0_i32_0 = arith.constant 0 : i32
    %c0_i32_1 = arith.constant 0 : i32
    return %c0_i32, %c0_i32_0 : i32, i32
  }
  func.func @transform_4(%arg0: i32, %arg1: i32) -> (i32, i32, i32) {
    %c2_i32 = arith.constant 2 : i32
    %0 = arith.muli %arg0, %c2_i32 : i32
    %1 = arith.addi %0, %arg1 : i32
    %c0_i32 = arith.constant 0 : i32
    %c0_i32_0 = arith.constant 0 : i32
    %c0_i32_1 = arith.constant 0 : i32
    return %1, %c0_i32, %c0_i32_0 : i32, i32, i32
  }
}

</mosaic_0001>

<bundles_post_ra>
// kernel: cogvideox_upsample3d_forward.1
= control target key start
LH: loop header
LB: loop body
LE: loop exit
PB: predicated region body
PF: predicated region fallthrough
CT: control target
= control target key end

     0   :  { %s2541_s15 = smov 0   ;;  %s2543_s16 = smov 0   ;;  %s3564_s0 = inlined_call_operand.vmem [shape: bf16[6,24,18,4], index: 0, kind: input, shape index: {}, may-alias: {0,1}]   ;;  %s3565_s1 = inlined_call_operand.vmem [shape: bf16[6,24,18,4], index: 1, kind: input, shape index: {}, may-alias: {0,1}]   ;;  %s3566_s2 = inlined_call_operand.vmem [shape: bf16[16,4,8], index: 2, kind: input, shape index: {}]   ;;  %s3567_s3 = inlined_call_operand.vmem [shape: f32[1,8], index: 3, kind: input, shape index: {}]   ;;  %s3568_s4 = inlined_call_operand.vmem [shape: f32[192,16,16], index: 4, kind: output, shape index: {}]  }
   0x1   :  { %s2545_s17 = smov 0   ;;  %s2547_s18 = smov 0  }
   0x2   :  { %s2549_s19 = smov 0  }
   0x3 LB: > { %s23_s20 = sadd.s32 1, %s2505_s17  ;;  %s26_s21 = sadd.s32 1, %s2509_s18  ;;  %s2513_s19 = sphi %s2549_s19, %s14_s19   ;;  %s2509_s18 = sphi %s2547_s18, %s3576_s18   ;;  %s2505_s17 = sphi %s2545_s17, %s3575_s17   ;;  %s2501_s16 = sphi %s2543_s16, %s3574_s16   ;;  %s2497_s15 = sphi %s2541_s15, %s3573_s15  }
   0x4   : > { %p24_p0 = scmp.ge.s32.totalorder %s23_s20, 2  ;;  %p2212_p1 = scmp.ge.s32.totalorder %s2513_s19, 1 }
   0x5   : > { %p208_p2 = scmp.lt.s32.totalorder %s2513_s19, 13 }
   0x6   : > { %s3578_s20 = smov (%p24_p0, %s23_s20), 0  ;;  %s3580_s21 = smov (!%p24_p0, %s26_s21), %s2509_s18 }
   0x7   : > { %p209_p3 = pnand %p2212_p1, %p208_p2  ;;  %p28_p4 = scmp.ge.s32.totalorder %s3580_s21, 6 }
   0x8   : > { %s2579_s24 = sshll.u32 (!%p209_p3), %s2497_s15, 3  ;;  %p254_p5 = scmp.lt.s32.totalorder (!%p209_p3), %s2501_s16, 5 }
   0x9   : > { %s3582_s21 = smov (%p28_p4, %s3580_s21), 0  ;;  %212 = sbr.rel (%p209_p3) target bundleno = 798 (0x31e), region = 36 }
   0xa   : > { %p256_p6 = scmp.lt.s32.totalorder (!%p209_p3), %s2579_s24, 23  ;;  %s2417_s25 = sadd.s32 (!%p209_p3), 8, %s2579_s24 }
   0xb   : > { %p268_p7 = scmp.lt.s32.totalorder (!%p209_p3), %s2417_s25, 23  ;;  %s2515_s10 = smov (!%p209_p3), 8  }
   0xe   : > { %vm567_vm0 = vcmask 1041408   ;;  %v2270_v0 = vld [vmem:[%s3566_s2 + $0x4] sm:$0x3]  ;;  %v320_v2 = vld [vmem:[%s3566_s2] sm:$0x3]  ;;  %s2591_s29 = scalar_select %p254_p5, %s2501_s16, 5 }
   0xf   : > { %v747_v1 = vsel %vm567_vm0, %v2270_v0, 0  ;;  %v2221_v3 = vld [vmem:[%s3566_s2 + $0x2] sm:$0x3]  ;;  %v685_v4 = vsel %vm567_vm0, %v320_v2, 0  ;;  %v2283_v6 = vld [vmem:[%s3566_s2 + $0x6] sm:$0x3] }
  0x10   : > { %756 = vmatpush.bf16.msra.mxu2 %v747_v1  ;;  %v569_v5 = vsel %vm567_vm0, %v2221_v3, 0  ;;  %s257_s6 = scalar_select %p256_p6, %s2579_s24, 23  ;;  %694 = vmatpush.bf16.msra.mxu1 %v685_v4  ;;  %v847_v7 = vsel %vm567_vm0, %v2283_v6, 0  ;;  %v2318_v8 = vld [vmem:[%s3566_s2 + $0xc] sm:$0x3]  ;;  %vm542_vm1 = vcmask 31744  }
  0x11   : > { %578 = vmatpush.bf16.msra.mxu0 %v569_v5  ;;  %s2430_s9 = smul.u32 72, %s2591_s29  ;;  %856 = vmatpush.bf16.msra.mxu3 %v847_v7  ;;  %v1159_v9 = vsel %vm567_vm0, %v2318_v8, 0  ;;  %v2327_v10 = vld [vmem:[%s3566_s2 + $0xe] sm:$0x3]  ;;  %v2293_v12 = vld [vmem:[%s3566_s2 + $0xa] sm:$0x3] }
  0x12   : > { %s2429_s12 = smul.u32 3, %s257_s6  ;;  %v1243_v11 = vsel %vm567_vm0, %v2327_v10, 0  ;;  %v2292_v13 = vld [vmem:[%s3566_s2 + $0x8] sm:$0x3]  ;;  %v1053_v14 = vsel %vm567_vm0, %v2293_v12, 0  ;;  %s3584_s25 = smov (!%p268_p7, %s2417_s25), 23 }
  0x13   : > { %v1105_v15 = vsel %vm567_vm0, %v2292_v13, 0  ;;  %vm323_vm2 = vsmask.f32 3328  ;;  %vm324_vm3 = vsmask.f32 7440  ;;  %s2431_s24 = smul.u32 3, %s3584_s25 }
  0x14   : > { %1168 = vmatpush.bf16.msrb.mxu2 %v1159_v9  ;;  %s260_s26 = sadd.s32 %s2430_s9, %s2429_s12  ;;  %1114 = vmatpush.bf16.msrb.mxu1 %v1105_v15  ;;  %vm2667_vm4 = vmor %vm323_vm2, %vm324_vm3  ;;  %vm945_vm5 = vcmask 1042432   ;;  %vm946_vm6 = vcmask 1046532   ;;  %vm1390_vm8 = vcmask 64512   ;;  %vm2067_vm9 = vcmask 130048  }
  0x15   : > { %1252 = vmatpush.bf16.msrb.mxu3 %v1243_v11  ;;  %1062 = vmatpush.bf16.msrb.mxu0 %v1053_v14  ;;  %s2214_s27 = sshll.u32 %s260_s26, 2  ;;  %s2677_s6 = sadd.s32 %s2431_s24, %s2430_s9  ;;  %vm2930_vm7 = vmor %vm945_vm5, %vm946_vm6 }
  0x16   : > { %s2623_s5 = scalar_lea.vmem %s3564_s0, %s2214_s27  ;;  %s2216_s29 = sshll.u32 %s2677_s6, 2 }
  0x17   : > { %v2626_v16 = vld [vmem:[%s2623_s5 + $0xc] sm:$0xff]  ;;  %v2419_v17 = vld [vmem:[%s2623_s5] sm:$0xff]  ;;  %v2638_v20 = vld [vmem:[%s2623_s5 + $0x8] sm:$0x1]  ;;  %s2863_s9 = scalar_lea.vmem %s3565_s1, %s2216_s29 }
  0x18   : > { %v2630_v18 = vld [vmem:[%s2623_s5] sm:$0xf]  ;;  %v2635_v19 = vld [vmem:[%s2623_s5 + $0x4] sm:$0xf]  ;;  %2275 = vmatmul.msk.bf16.vlgmr.msra.gmra.mxu2 %vm542_vm1, %v2626_v16  ;;  %2262 = vmatmul.msk.bf16.vlgmr.msra.gmra.mxu1 %vm542_vm1, %v2419_v17  ;;  %v346_v25 = vshll.u32 %v2638_v20, 16  ;;  %v2697_v8 = vld [vmem:[%s2623_s5 + $0x18] sm:$0xff] }
  0x19   : > { %v327_v21 = vshrl.u32 %v2630_v18, 16  ;;  %v330_v22 = vshll.u32 %v2630_v18, 16  ;;  %v336_v23 = vshll.u32 %v2635_v19, 16  ;;  %v340_v24 = vshrl.u32 %v2635_v19, 16  ;;  %v2649_v26 = vld [vmem:[%s2623_s5 + $0xc] sm:$0xf] }
  0x1a   : > { %v2652_v29 = vld [vmem:[%s2623_s5 + $0x10] sm:$0xf]  ;;  %v2655_v30 = vld [vmem:[%s2623_s5 + $0x14] sm:$0x1]  ;;  %v351_v33 = vshrl.u32 %v2649_v26, 16  ;;  %v354_v35 = vshll.u32 %v2649_v26, 16 }
  0x1b   : > { %v329_v27 = vrot.slane %v327_v21, 4  ;;  %v332_v28 = vrot.slane %v330_v22, 5  ;;  %v338_v31 = vrot.slane %v336_v23, 5  ;;  %v342_v32 = vrot.slane %v340_v24, 4  ;;  %v2662_v38 = vld [vmem:[%s2623_s5 + $0x18] sm:$0xf] }
  0x1c   : > { %v360_v36 = vshll.u32 %v2652_v29, 16  ;;  %v364_v37 = vshrl.u32 %v2652_v29, 16  ;;  %v348_v41 = vrot.slane %v346_v25, 5  ;;  %v353_v42 = vrot.slane %v351_v33, 4  ;;  %v2673_v44 = vld [vmem:[%s2623_s5 + $0x1c] sm:$0xf] }
  0x1d   : > { %v333_v34 = vor.u32 %v332_v28, %v329_v27  ;;  %v343_v40 = vor.u32 %v342_v32, %v338_v31  ;;  %v370_v43 = vshll.u32 %v2655_v30, 16  ;;  %v356_v46 = vrot.slane %v354_v35, 5  ;;  %v2687_v0 = vld [vmem:[%s2623_s5 + $0x20] sm:$0x1]  ;;  %v2711_v21 = vld [vmem:[%s2623_s5 + $0x24] sm:$0xf] }
  0x1e   : > { %v362_v47 = vrot.slane %v360_v36, 5  ;;  %v366_v48 = vrot.slane %v364_v37, 4  ;;  %v375_v51 = vshrl.u32 %v2662_v38, 16  ;;  %v378_v52 = vshll.u32 %v2662_v38, 16  ;;  %v2714_v22 = vld [vmem:[%s2623_s5 + $0x28] sm:$0xf] }
  0x1f   : > { %v334_v45 = vrot.slane %v333_v34, 4  ;;  %v344_v49 = vrot.slane %v343_v40, 4  ;;  %v372_v50 = vrot.slane %v370_v43, 5  ;;  %v357_v54 = vor.u32 %v356_v46, %v353_v42  ;;  %v2725_v40 = vld [vmem:[%s2623_s5 + $0x2c] sm:$0x1]  ;;  %v2730_v42 = vld [vmem:[%s2623_s5 + $0x24] sm:$0xff] }
  0x20   : > { %v367_v55 = vor.u32 %v366_v48, %v362_v47  ;;  %v384_v56 = vshll.u32 %v2673_v44, 16  ;;  %v377_v59 = vrot.slane %v375_v51, 4  ;;  %v380_v63 = vrot.slane %v378_v52, 5  ;;  %v2745_v51 = vld [vmem:[%s2623_s5 + $0x34] sm:$0xf] }
  0x21   : > { %v339_v53 = vsel %vm2667_vm4, %v334_v45, %v338_v31  ;;  %v349_v57 = vsel %vm2667_vm4, %v344_v49, %v348_v41  ;;  %v358_v61 = vrot.slane %v357_v54, 4  ;;  %v388_v2 = vshrl.u32 %v2673_v44, 16 }
  0x22   : > { %v518_v58 = vunpack.c.l.b16 %v339_v53  ;;  %v519_v60 = vunpack.c.l.b16 %v349_v57  ;;  %v368_v62 = vrot.slane %v367_v55, 4  ;;  %v386_v1 = vrot.slane %v384_v56, 5 }
  0x23   : > { %v363_v4 = vsel %vm2667_vm4, %v358_v61, %v362_v47  ;;  %v390_v9 = vrot.slane %v388_v2, 4  ;;  %v381_v10 = vor.u32 %v380_v63, %v377_v59  ;;  %v394_v11 = vshll.u32 %v2687_v0, 16 }
  0x24   : > { %v2690_v3 = vpack.c.b16 %v519_v60, %v518_v58  ;;  %v373_v5 = vsel %vm2667_vm4, %v368_v62, %v372_v50  ;;  %v520_v6 = vunpack.c.l.b16 %v363_v4  ;;  %v399_v23 = vshrl.u32 %v2711_v21, 16  ;;  %v2742_v50 = vld [vmem:[%s2623_s5 + $0x30] sm:$0xf] }
  0x25   : > { %v521_v7 = vunpack.c.l.b16 %v373_v5  ;;  %v391_v13 = vor.u32 %v390_v9, %v386_v1  ;;  %v382_v14 = vrot.slane %v381_v10, 4  ;;  %v396_v17 = vrot.slane %v394_v11, 5  ;;  %v2761_v4 = vld [vmem:[%s2623_s5 + $0x30] sm:$0xff]  ;;  %v2771_v9 = vld [vmem:[%s2623_s5 + $0x3c] sm:$0xf] }
  0x26   : > { %2222 = vmatmul.msk.bf16.vlgmr.msra.gmra.mxu0 %vm542_vm1, %v2690_v3  ;;  %v402_v24 = vshll.u32 %v2711_v21, 16  ;;  %v408_v28 = vshll.u32 %v2714_v22, 16  ;;  %v412_v31 = vshrl.u32 %v2714_v22, 16  ;;  %v401_v34 = vrot.slane %v399_v23, 4  ;;  %v2774_v10 = vld [vmem:[%s2623_s5 + $0x40] sm:$0xf] }
  0x27   : > { %v2702_v12 = vpack.c.b16 %v521_v7, %v520_v6  ;;  %v392_v15 = vrot.slane %v391_v13, 4  ;;  %v387_v25 = vsel %vm2667_vm4, %v382_v14, %v386_v1  ;;  %v418_v46 = vshll.u32 %v2725_v40, 16  ;;  %v2756_v1 = vld [vmem:[%s2623_s5 + $0x38] sm:$0x1] }
  0x28   : > { %2276 = vmatmul.msk.bf16.gmra.mxu2 %vm542_vm1, %v2697_v8  ;;  %2263 = vmatmul.msk.bf16.gmra.mxu1 %vm542_vm1, %v2626_v16  ;;  %v522_v32 = vunpack.c.l.b16 %v387_v25  ;;  %v404_v35 = vrot.slane %v402_v24, 5  ;;  %v410_v36 = vrot.slane %v408_v28, 5  ;;  %v414_v37 = vrot.slane %v412_v31, 4 }
  0x29   : > { %2284 = vmatmul.msk.bf16.vlgmr.msra.gmra.mxu3 %vm542_vm1, %v2702_v12  ;;  %v397_v27 = vsel %vm2667_vm4, %v392_v15, %v396_v17  ;;  %v420_v49 = vrot.slane %v418_v46, 5  ;;  %v423_v53 = vshrl.u32 %v2742_v50, 16  ;;  %v426_v55 = vshll.u32 %v2742_v50, 16 }
  0x2a   : > { %v523_v33 = vunpack.c.l.b16 %v397_v27  ;;  %v405_v43 = vor.u32 %v404_v35, %v401_v34  ;;  %v415_v45 = vor.u32 %v414_v37, %v410_v36  ;;  %v432_v56 = vshll.u32 %v2745_v51, 16 }
  0x2b   : > { %v436_v57 = vshrl.u32 %v2745_v51, 16  ;;  %v425_v60 = vrot.slane %v423_v53, 4  ;;  %v428_v61 = vrot.slane %v426_v55, 5  ;;  %v442_v7 = vshll.u32 %v2756_v1, 16  ;;  %v2804_v53 = vld [vmem:[%s2623_s5 + $0x48] sm:$0xf] }
  0x2c   : > { %v2727_v41 = vpack.c.b16 %v523_v33, %v522_v32  ;;  %v406_v47 = vrot.slane %v405_v43, 4  ;;  %v416_v48 = vrot.slane %v415_v45, 4  ;;  %v434_v62 = vrot.slane %v432_v56, 5 }
  0x2d   : > { %v438_v63 = vrot.slane %v436_v57, 4  ;;  %v429_v5 = vor.u32 %v428_v61, %v425_v60  ;;  %v444_v14 = vrot.slane %v442_v7, 5  ;;  %v447_v15 = vshrl.u32 %v2771_v9, 16 }
  0x2e   : > { %v411_v52 = vsel %vm2667_vm4, %v406_v47, %v410_v36  ;;  %v421_v54 = vsel %vm2667_vm4, %v416_v48, %v420_v49  ;;  %v450_v17 = vshll.u32 %v2771_v9, 16  ;;  %v456_v23 = vshll.u32 %v2774_v10, 16  ;;  %v2787_v36 = vld [vmem:[%s2623_s5 + $0x44] sm:$0x1]  ;;  %v2793_v47 = vld [vmem:[%s2623_s5 + $0x3c] sm:$0xff] }
  0x2f   : > { %v524_v58 = vunpack.c.l.b16 %v411_v52  ;;  %v525_v59 = vunpack.c.l.b16 %v421_v54  ;;  %v439_v6 = vor.u32 %v438_v63, %v434_v62  ;;  %v430_v11 = vrot.slane %v429_v5, 4  ;;  %v2807_v54 = vld [vmem:[%s2623_s5 + $0x4c] sm:$0xf] }
  0x30   : > { %v460_v24 = vshrl.u32 %v2774_v10, 16  ;;  %v449_v28 = vrot.slane %v447_v15, 4  ;;  %v452_v31 = vrot.slane %v450_v17, 5  ;;  %v458_v32 = vrot.slane %v456_v23, 5 }
  0x31   : > { %v2758_v2 = vpack.c.b16 %v525_v59, %v524_v58  ;;  %v440_v13 = vrot.slane %v439_v6, 4  ;;  %v435_v25 = vsel %vm2667_vm4, %v430_v11, %v434_v62  ;;  %v466_v45 = vshll.u32 %v2787_v36, 16  ;;  %v2818_v11 = vld [vmem:[%s2623_s5 + $0x50] sm:$0x1] }
  0x32   : > { %v462_v33 = vrot.slane %v460_v24, 4  ;;  %v526_v34 = vunpack.c.l.b16 %v435_v25  ;;  %v453_v37 = vor.u32 %v452_v31, %v449_v28  ;;  %v471_v57 = vshrl.u32 %v2804_v53, 16  ;;  %v2835_v28 = vld [vmem:[%s2623_s5 + $0x54] sm:$0xf]  ;;  %v2838_v31 = vld [vmem:[%s2623_s5 + $0x58] sm:$0xf] }
  0x33   : > { %v445_v27 = vsel %vm2667_vm4, %v440_v13, %v444_v14  ;;  %v468_v52 = vrot.slane %v466_v45, 5  ;;  %v474_v58 = vshll.u32 %v2804_v53, 16  ;;  %v480_v59 = vshll.u32 %v2807_v54, 16  ;;  %v2823_v14 = vld [vmem:[%s2623_s5 + $0x48] sm:$0xff] }
  0x34   : > { %v527_v35 = vunpack.c.l.b16 %v445_v27  ;;  %v463_v43 = vor.u32 %v462_v33, %v458_v32  ;;  %v454_v48 = vrot.slane %v453_v37, 4  ;;  %v484_v60 = vshrl.u32 %v2807_v54, 16 }
  0x35   : > { %v473_v63 = vrot.slane %v471_v57, 4  ;;  %v476_v5 = vrot.slane %v474_v58, 5  ;;  %v482_v6 = vrot.slane %v480_v59, 5  ;;  %v490_v23 = vshll.u32 %v2818_v11, 16  ;;  %v2849_v57 = vld [vmem:[%s2623_s5 + $0x5c] sm:$0x1] }
  0x36   : > { %2223 = vmatmul.msk.bf16.gmra.mxu0 %vm542_vm1, %v2702_v12  ;;  %v2790_v46 = vpack.c.b16 %v527_v35, %v526_v34  ;;  %v464_v49 = vrot.slane %v463_v43, 4  ;;  %v459_v55 = vsel %vm2667_vm4, %v454_v48, %v458_v32  ;;  %v486_v7 = vrot.slane %v484_v60, 4  ;;  %v2855_v59 = vld [vmem:[%s2623_s5 + $0x54] sm:$0xff] }
  0x37   : > { %v528_v61 = vunpack.c.l.b16 %v459_v55  ;;  %v477_v15 = vor.u32 %v476_v5, %v473_v63  ;;  %v492_v27 = vrot.slane %v490_v23, 5  ;;  %v495_v34 = vshrl.u32 %v2835_v28, 16  ;;  %v2870_v63 = vld [vmem:[%s2863_s9] sm:$0xf]  ;;  %v2873_v5 = vld [vmem:[%s2863_s9 + $0x4] sm:$0xf] }
  0x38   : > { %2277 = vmatmul.msk.bf16.gmra.mxu2 %vm542_vm1, %v2730_v42  ;;  %2264 = vmatmul.msk.bf16.gmra.mxu1 %vm542_vm1, %v2697_v8  ;;  %v469_v56 = vsel %vm2667_vm4, %v464_v49, %v468_v52  ;;  %v487_v17 = vor.u32 %v486_v7, %v482_v6  ;;  %v498_v35 = vshll.u32 %v2835_v28, 16  ;;  %v504_v37 = vshll.u32 %v2838_v31, 16 }
  0x39   : > { %2285 = vmatmul.msk.bf16.gmra.mxu3 %vm542_vm1, %v2727_v41  ;;  %v529_v62 = vunpack.c.l.b16 %v469_v56  ;;  %v478_v24 = vrot.slane %v477_v15, 4  ;;  %v508_v43 = vshrl.u32 %v2838_v31, 16  ;;  %v497_v49 = vrot.slane %v495_v34, 4 }
  0x3a   : > { %v488_v25 = vrot.slane %v487_v17, 4  ;;  %v500_v52 = vrot.slane %v498_v35, 5  ;;  %v506_v55 = vrot.slane %v504_v37, 5  ;;  %v817_v17 = vshrl.u32 %v2870_v63, 16 }
  0x3b   : > { %v2820_v13 = vpack.c.b16 %v529_v62, %v528_v61  ;;  %v483_v32 = vsel %vm2667_vm4, %v478_v24, %v482_v6  ;;  %v510_v56 = vrot.slane %v508_v43, 4  ;;  %v514_v62 = vshll.u32 %v2849_v57, 16 }
  0x3c   : > { %v493_v33 = vsel %vm2667_vm4, %v488_v25, %v492_v27  ;;  %v530_v45 = vunpack.c.l.b16 %v483_v32  ;;  %v501_v60 = vor.u32 %v500_v52, %v497_v49  ;;  %v820_v23 = vshll.u32 %v2870_v63, 16 }
  0x3d   : > { %v531_v48 = vunpack.c.l.b16 %v493_v33  ;;  %v511_v61 = vor.u32 %v510_v56, %v506_v55  ;;  %v516_v15 = vrot.slane %v514_v62, 5  ;;  %v826_v24 = vshll.u32 %v2873_v5, 16  ;;  %v2355_v56 = vld [vmem:[%s3566_s2 + $0x14] sm:$0x3] }
  0x3e   : > { %v502_v6 = vrot.slane %v501_v60, 4  ;;  %v830_v25 = vshrl.u32 %v2873_v5, 16  ;;  %v819_v33 = vrot.slane %v817_v17, 4  ;;  %v822_v34 = vrot.slane %v820_v23, 5  ;;  %v2338_v17 = vld [vmem:[%s3566_s2 + $0x12] sm:$0x3] }
  0x3f   : > { %v2852_v58 = vpack.c.b16 %v531_v48, %v530_v45  ;;  %v512_v7 = vrot.slane %v511_v61, 4  ;;  %v828_v35 = vrot.slane %v826_v24, 5  ;;  %v2886_v48 = vld [vmem:[%s2863_s9 + $0x8] sm:$0x1]  ;;  %v1526_v61 = vsel %vm567_vm0, %v2355_v56, 0 }
  0x40   : > { %v507_v27 = vsel %vm2667_vm4, %v502_v6, %v506_v55  ;;  %v832_v37 = vrot.slane %v830_v25, 4  ;;  %v823_v49 = vor.u32 %v822_v34, %v819_v33  ;;  %v2894_v55 = vld [vmem:[%s2863_s9] sm:$0xff]  ;;  %v836_v62 = vshll.u32 %v2886_v48, 16  ;;  %1535 = vmatpush.bf16.msra.mxu2 %v1526_v61  ;;  %v2337_v23 = vld [vmem:[%s3566_s2 + $0x10] sm:$0x3] }
  0x41   : > { %v517_v32 = vsel %vm2667_vm4, %v512_v7, %v516_v15  ;;  %v532_v43 = vunpack.c.l.b16 %v507_v27  ;;  %v2368_v15 = vld [vmem:[%s3566_s2 + $0x16] sm:$0x3]  ;;  %v1412_v27 = vsel %vm567_vm0, %v2338_v17, 0  ;;  %v957_v56 = vrot.slane %v2652_v29, 5 }
  0x42   : > { %v533_v45 = vunpack.c.l.b16 %v517_v32  ;;  %v833_v52 = vor.u32 %v832_v37, %v828_v35  ;;  %v824_v6 = vrot.slane %v823_v49, 4  ;;  %v838_v24 = vrot.slane %v836_v62, 5  ;;  %1421 = vmatpush.bf16.msra.mxu0 %v1412_v27 }
  0x43   : > { %v1626_v25 = vsel %vm567_vm0, %v2368_v15, 0  ;;  %v1464_v32 = vsel %vm567_vm0, %v2337_v23, 0  ;;  %v953_v61 = vrot.slane %v2638_v20, 5  ;;  %v959_v29 = vrot.slane %v957_v56, 4 }
  0x44   : > { %v2891_v60 = vpack.c.b16 %v533_v45, %v532_v43  ;;  %v834_v7 = vrot.slane %v833_v52, 4  ;;  %1635 = vmatpush.bf16.msra.mxu3 %v1626_v25  ;;  %1473 = vmatpush.bf16.msra.mxu1 %v1464_v32  ;;  %v829_v33 = vsel %vm2667_vm4, %v824_v6, %v828_v35  ;;  %v950_v45 = vrot.slane %v2635_v19, 5 }
  0x45   : > { %v840_v37 = vunpack.c.l.b16 %v829_v33  ;;  %v2294_v35 = vrot.slane %v2630_v18, 9  ;;  %v2295_v19 = vrot.slane %v2649_v26, 9  ;;  %v960_v20 = vrot.slane %v2655_v30, 5 }
  0x46   : > { %2224 = vmatmul.msk.bf16.gmra.mxu0 %vm542_vm1, %v2727_v41  ;;  %v839_v34 = vsel %vm2667_vm4, %v834_v7, %v838_v24  ;;  %v952_v62 = vrot.slane %v950_v45, 4 }
  0x47   : > { %v841_v43 = vunpack.c.l.b16 %v839_v34  ;;  %v951_v18 = vsel %vm2930_vm7, %v2294_v35, %v950_v45  ;;  %v958_v25 = vsel %vm2930_vm7, %v2295_v19, %v957_v56  ;;  %v964_v45 = vrot.slane %v2673_v44, 5 }
  0x48   : > { %2278 = vmatmul.msk.bf16.gmra.mxu2 %vm542_vm1, %v2761_v4  ;;  %2265 = vmatmul.msk.bf16.gmra.mxu1 %vm542_vm1, %v2730_v42  ;;  %v954_v7 = vsel %vm2930_vm7, %v952_v62, %v953_v61  ;;  %v1004_v23 = vunpack.c.l.b16 %v951_v18  ;;  %v1006_v26 = vunpack.c.l.b16 %v958_v25  ;;  %v967_v35 = vrot.slane %v2687_v0, 5 }
  0x49   : > { %2286 = vmatmul.msk.bf16.gmra.mxu3 %vm542_vm1, %v2758_v2  ;;  %v2923_v49 = vpack.c.b16 %v841_v43, %v840_v37  ;;  %v1005_v24 = vunpack.c.l.b16 %v954_v7  ;;  %v966_v56 = vrot.slane %v964_v45, 4 }
  0x4b   : > { %v1020_v32 = vpack.c.b16 %v1005_v24, %v1004_v23 }
  0x56   : > { %2225 = vmatmul.msk.bf16.gmra.mxu0 %vm542_vm1, %v2758_v2 }
  0x58   : > { %2279 = vmatmul.msk.bf16.gmra.mxu2 %vm542_vm1, %v2793_v47  ;;  %2266 = vmatmul.msk.bf16.gmra.mxu1 %vm542_vm1, %v2761_v4 }
  0x59   : > { %2287 = vmatmul.msk.bf16.gmra.mxu3 %vm542_vm1, %v2790_v46 }
  0x66   : > { %2226 = vmatmul.msk.bf16.gmra.mxu0 %vm542_vm1, %v2790_v46 }
  0x68   : > { %2280 = vmatmul.msk.bf16.gmra.mxu2 %vm542_vm1, %v2823_v14  ;;  %2267 = vmatmul.msk.bf16.gmra.mxu1 %vm542_vm1, %v2793_v47 }
  0x69   : > { %2288 = vmatmul.msk.bf16.gmra.mxu3 %vm542_vm1, %v2820_v13 }
  0x76   : > { %2227 = vmatmul.msk.bf16.gmra.mxu0 %vm542_vm1, %v2820_v13 }
  0x78   : > { %2281 = vmatmul.msk.bf16.gmra.mxu2 %vm542_vm1, %v2855_v59  ;;  %2268 = vmatmul.msk.bf16.gmra.mxu1 %vm542_vm1, %v2823_v14 }
  0x79   : > { %2289 = vmatmul.msk.bf16.gmra.mxu3 %vm542_vm1, %v2852_v58 }
  0x86   : > { %2228 = vmatmul.msk.bf16.gmra.mxu0 %vm542_vm1, %v2852_v58 }
  0x88   : > { %2282 = vmatmul.msk.bf16.gmra.mxu2 %vm542_vm1, %v2894_v55  ;;  %2269 = vmatmul.msk.bf16.gmra.mxu1 %vm542_vm1, %v2855_v59 }
  0x89   : > { %2290 = vmatmul.msk.bf16.gmra.mxu3 %vm542_vm1, %v2891_v60 }
  0x95   : > { %v696_v52 = vpop.f32.mrf.mxu1 }
  0x96   : > { %2229 = vmatmul.msk.bf16.gmra.mxu0 %vm542_vm1, %v2891_v60 }
  0x98   : > { %2319 = vmatmul.msk.bf16.vlgmr.msrb.gmra.mxu2 %vm542_vm1, %v2702_v12  ;;  %2310 = vmatmul.msk.bf16.vlgmr.msrb.gmra.mxu1 %vm542_vm1, %v2690_v3  ;;  %v961_v3 = vsel %vm2930_vm7, %v959_v29, %v960_v20 }
  0x99   : > { %2291 = vmatmul.msk.bf16.gmra.mxu3 %vm542_vm1, %v2923_v49  ;;  %v1007_v27 = vunpack.c.l.b16 %v961_v3 }
  0x9b   : > { %v758_v15 = vpop.f32.mrf.mxu2  ;;  %v2950_v37 = vpack.c.b16 %v1007_v27, %v1006_v26 }
  0x9d   : > { %v698_v17 = vpop.f32.mrf.mxu1 }
  0xa3   : > { %v580_v30 = vpop.f32.mrf.mxu0  ;;  %v760_v34 = vpop.f32.mrf.mxu2 }
  0xa4   : > { %v697_v33 = vadd.f32 %v696_v52, %v580_v30  ;;  %v2296_v52 = vrot.slane %v2662_v38, 9  ;;  %v971_v30 = vrot.slane %v2714_v22, 5 }
  0xa5   : > { %v701_v61 = vpop.f32.mrf.mxu1 }
  0xa6   : > { %2302 = vmatmul.msk.bf16.vlgmr.msrb.gmra.mxu0 %vm542_vm1, %v1020_v32  ;;  %v798_v43 = vadd.f32 %v758_v15, %v697_v33  ;;  %v965_v7 = vsel %vm2930_vm7, %v2296_v52, %v964_v45  ;;  %v968_v15 = vsel %vm2930_vm7, %v966_v56, %v967_v35  ;;  %v974_v45 = vrot.slane %v2725_v40, 5 }
  0xa7   : > { %v1008_v24 = vunpack.c.l.b16 %v965_v7  ;;  %v1009_v25 = vunpack.c.l.b16 %v968_v15 }
  0xa8   : > { %2320 = vmatmul.msk.bf16.gmra.mxu2 %vm542_vm1, %v2727_v41  ;;  %2311 = vmatmul.msk.bf16.gmra.mxu1 %vm542_vm1, %v2702_v12 }
  0xa9   : > { %2329 = vmatmul.msk.bf16.vlgmr.msrb.gmra.mxu3 %vm542_vm1, %v2950_v37 }
  0xab   : > { %v582_v62 = vpop.f32.mrf.mxu0  ;;  %v763_v20 = vpop.f32.mrf.mxu2 }
  0xac   : > { %v858_v19 = vpop.f32.mrf.mxu3  ;;  %v699_v29 = vadd.f32 %v698_v17, %v582_v62  ;;  %v2970_v17 = vpack.c.b16 %v1009_v25, %v1008_v24 }
  0xad   : > { %v2962_v44 = vadd.f32 %v858_v19, %v798_v43  ;;  %v703_v23 = vpop.f32.mrf.mxu1  ;;  %v973_v43 = vrot.slane %v971_v30, 4 }
  0xae   : > { %v799_v18 = vadd.f32 %v760_v34, %v699_v29  ;;  %v2297_v34 = vrot.slane %v2711_v21, 9 }
  0xaf   : > { %v975_v29 = vsel %vm2930_vm7, %v973_v43, %v974_v45 }
  0xb0   : > { %v972_v19 = vsel %vm2930_vm7, %v2297_v34, %v971_v30  ;;  %v1011_v7 = vunpack.c.l.b16 %v975_v29  ;;  %v981_v30 = vrot.slane %v2756_v1, 5 }
  0xb3   : > { %v585_v38 = vpop.f32.mrf.mxu0  ;;  %v765_v0 = vpop.f32.mrf.mxu2 }
  0xb4   : > { %v860_v3 = vpop.f32.mrf.mxu3  ;;  %v702_v26 = vadd.f32 %v701_v61, %v585_v38 }
  0xb5   : > { %v2968_v27 = vadd.f32 %v860_v3, %v799_v18  ;;  %v706_v33 = vpop.f32.mrf.mxu1  ;;  %v1010_v18 = vunpack.c.l.b16 %v972_v19  ;;  %v978_v3 = vrot.slane %v2745_v51, 5 }
  0xb6   : > { %2303 = vmatmul.msk.bf16.gmra.mxu0 %vm542_vm1, %v2950_v37  ;;  %v800_v32 = vadd.f32 %v763_v20, %v702_v26 }
  0xb8   : > { %2321 = vmatmul.msk.bf16.gmra.mxu2 %vm542_vm1, %v2758_v2  ;;  %2312 = vmatmul.msk.bf16.gmra.mxu1 %vm542_vm1, %v2727_v41 }
  0xb9   : > { %2330 = vmatmul.msk.bf16.gmra.mxu3 %vm542_vm1, %v2970_v17 }
  0xbb   : > { %v587_v61 = vpop.f32.mrf.mxu0  ;;  %v768_v35 = vpop.f32.mrf.mxu2 }
  0xbc   : > { %v863_v52 = vpop.f32.mrf.mxu3  ;;  %v704_v56 = vadd.f32 %v703_v23, %v587_v61  ;;  %v2991_v23 = vpack.c.b16 %v1011_v7, %v1010_v18 }
  0xbd   : > { %v2983_v22 = vadd.f32 %v863_v52, %v800_v32  ;;  %v708_v20 = vpop.f32.mrf.mxu1  ;;  %v980_v32 = vrot.slane %v978_v3, 4 }
  0xbe   : > { %v801_v62 = vadd.f32 %v765_v0, %v704_v56  ;;  %v2298_v0 = vrot.slane %v2742_v50, 9 }
  0xbf   : > { %v982_v56 = vsel %vm2930_vm7, %v980_v32, %v981_v30 }
  0xc0   : > { %v979_v52 = vsel %vm2930_vm7, %v2298_v0, %v978_v3  ;;  %v1013_v19 = vunpack.c.l.b16 %v982_v56  ;;  %v988_v3 = vrot.slane %v2787_v36, 5 }
  0xc3   : > { %v590_v21 = vpop.f32.mrf.mxu0  ;;  %v770_v40 = vpop.f32.mrf.mxu2 }
  0xc4   : > { %v865_v15 = vpop.f32.mrf.mxu3  ;;  %v707_v24 = vadd.f32 %v706_v33, %v590_v21 }
  0xc5   : > { %v2989_v25 = vadd.f32 %v865_v15, %v801_v62  ;;  %v711_v26 = vpop.f32.mrf.mxu1  ;;  %v1012_v62 = vunpack.c.l.b16 %v979_v52  ;;  %v985_v15 = vrot.slane %v2774_v10, 5 }
  0xc6   : > { %2304 = vmatmul.msk.bf16.gmra.mxu0 %vm542_vm1, %v2970_v17  ;;  %v802_v38 = vadd.f32 %v768_v35, %v707_v24 }
  0xc8   : > { %2322 = vmatmul.msk.bf16.gmra.mxu2 %vm542_vm1, %v2790_v46  ;;  %2313 = vmatmul.msk.bf16.gmra.mxu1 %vm542_vm1, %v2758_v2 }
  0xc9   : > { %2331 = vmatmul.msk.bf16.gmra.mxu3 %vm542_vm1, %v2991_v23 }
  0xcb   : > { %v592_v33 = vpop.f32.mrf.mxu0  ;;  %v773_v45 = vpop.f32.mrf.mxu2 }
  0xcc   : > { %v868_v34 = vpop.f32.mrf.mxu3  ;;  %v709_v43 = vadd.f32 %v708_v20, %v592_v33  ;;  %v3012_v20 = vpack.c.b16 %v1013_v19, %v1012_v62 }
  0xcd   : > { %v3004_v51 = vadd.f32 %v868_v34, %v802_v38  ;;  %v713_v35 = vpop.f32.mrf.mxu1  ;;  %v987_v38 = vrot.slane %v985_v15, 4 }
  0xce   : > { %v803_v61 = vadd.f32 %v770_v40, %v709_v43  ;;  %v2299_v40 = vrot.slane %v2771_v9, 9 }
  0xcf   : > { %v989_v43 = vsel %vm2930_vm7, %v987_v38, %v988_v3 }
  0xd0   : > { %v986_v34 = vsel %vm2930_vm7, %v2299_v40, %v985_v15  ;;  %v1015_v52 = vunpack.c.l.b16 %v989_v43  ;;  %v995_v15 = vrot.slane %v2818_v11, 5 }
  0xd3   : > { %v595_v50 = vpop.f32.mrf.mxu0  ;;  %v775_v1 = vpop.f32.mrf.mxu2 }
  0xd4   : > { %v870_v29 = vpop.f32.mrf.mxu3  ;;  %v712_v18 = vadd.f32 %v711_v26, %v595_v50 }
  0xd5   : > { %v3010_v7 = vadd.f32 %v870_v29, %v803_v61  ;;  %v716_v24 = vpop.f32.mrf.mxu1  ;;  %v1014_v61 = vunpack.c.l.b16 %v986_v34  ;;  %v992_v29 = vrot.slane %v2807_v54, 5 }
  0xd6   : > { %2305 = vmatmul.msk.bf16.gmra.mxu0 %vm542_vm1, %v2991_v23  ;;  %v804_v21 = vadd.f32 %v773_v45, %v712_v18 }
  0xd8   : > { %2323 = vmatmul.msk.bf16.gmra.mxu2 %vm542_vm1, %v2820_v13  ;;  %2314 = vmatmul.msk.bf16.gmra.mxu1 %vm542_vm1, %v2790_v46 }
  0xd9   : > { %2332 = vmatmul.msk.bf16.gmra.mxu3 %vm542_vm1, %v3012_v20 }
  0xdb   : > { %v597_v26 = vpop.f32.mrf.mxu0  ;;  %v778_v30 = vpop.f32.mrf.mxu2 }
  0xdc   : > { %v873_v0 = vpop.f32.mrf.mxu3  ;;  %v714_v32 = vadd.f32 %v713_v35, %v597_v26  ;;  %v3033_v35 = vpack.c.b16 %v1015_v52, %v1014_v61 }
  0xdd   : > { %v3025_v10 = vadd.f32 %v873_v0, %v804_v21  ;;  %v718_v45 = vpop.f32.mrf.mxu1  ;;  %v994_v21 = vrot.slane %v992_v29, 4 }
  0xde   : > { %v805_v33 = vadd.f32 %v775_v1, %v714_v32  ;;  %v2300_v1 = vrot.slane %v2804_v53, 9 }
  0xdf   : > { %v996_v32 = vsel %vm2930_vm7, %v994_v21, %v995_v15 }
  0xe0   : > { %v993_v0 = vsel %vm2930_vm7, %v2300_v1, %v992_v29  ;;  %v1017_v34 = vunpack.c.l.b16 %v996_v32  ;;  %v1002_v29 = vrot.slane %v2849_v57, 5 }
  0xe3   : > { %v600_v9 = vpop.f32.mrf.mxu0  ;;  %v780_v36 = vpop.f32.mrf.mxu2 }
  0xe4   : > { %v875_v56 = vpop.f32.mrf.mxu3  ;;  %v717_v62 = vadd.f32 %v716_v24, %v600_v9 }
  0xe5   : > { %v3031_v19 = vadd.f32 %v875_v56, %v805_v33  ;;  %v721_v18 = vpop.f32.mrf.mxu1  ;;  %v1016_v33 = vunpack.c.l.b16 %v993_v0  ;;  %v999_v56 = vrot.slane %v2838_v31, 5 }
  0xe6   : > { %2306 = vmatmul.msk.bf16.gmra.mxu0 %vm542_vm1, %v3012_v20  ;;  %v806_v50 = vadd.f32 %v778_v30, %v717_v62 }
  0xe8   : > { %2324 = vmatmul.msk.bf16.gmra.mxu2 %vm542_vm1, %v2852_v58  ;;  %2315 = vmatmul.msk.bf16.gmra.mxu1 %vm542_vm1, %v2820_v13 }
  0xe9   : > { %2333 = vmatmul.msk.bf16.gmra.mxu3 %vm542_vm1, %v3033_v35 }
  0xeb   : > { %v602_v24 = vpop.f32.mrf.mxu0  ;;  %v783_v3 = vpop.f32.mrf.mxu2 }
  0xec   : > { %v878_v40 = vpop.f32.mrf.mxu3  ;;  %v719_v38 = vadd.f32 %v718_v45, %v602_v24  ;;  %v3054_v45 = vpack.c.b16 %v1017_v34, %v1016_v33  ;;  %v1231_v34 = vrot.slane %v2873_v5, 5  ;;  %v2404_v5 = vld [vmem:[%s3566_s2 + $0x1e] sm:$0x3] }
  0xed   : > { %v3046_v54 = vadd.f32 %v878_v40, %v806_v50  ;;  %v723_v30 = vpop.f32.mrf.mxu1  ;;  %v1001_v50 = vrot.slane %v999_v56, 4 }
  0xee   : > { %v807_v26 = vadd.f32 %v780_v36, %v719_v38  ;;  %v2301_v36 = vrot.slane %v2835_v28, 9 }
  0xef   : > { %v1003_v38 = vsel %vm2930_vm7, %v1001_v50, %v1002_v29  ;;  %v1234_v50 = vrot.slane %v2886_v48, 5  ;;  %v1904_v29 = vsel %vm567_vm0, %v2404_v5, 0 }
  0xf0   : > { %v1000_v40 = vsel %vm2930_vm7, %v2301_v36, %v999_v56  ;;  %v1019_v0 = vunpack.c.l.b16 %v1003_v38  ;;  %v1233_v56 = vrot.slane %v1231_v34, 4  ;;  %v2378_v36 = vld [vmem:[%s3566_s2 + $0x1a] sm:$0x3]  ;;  %1913 = vmatpush.bf16.msrb.mxu3 %v1904_v29 }
  0xf3   : > { %v605_v53 = vpop.f32.mrf.mxu0  ;;  %v785_v11 = vpop.f32.mrf.mxu2 }
  0xf4   : > { %v880_v43 = vpop.f32.mrf.mxu3  ;;  %v722_v61 = vadd.f32 %v721_v18, %v605_v53 }
  0xf5   : > { %v3052_v52 = vadd.f32 %v880_v43, %v807_v26  ;;  %v726_v62 = vpop.f32.mrf.mxu1  ;;  %v1018_v26 = vunpack.c.l.b16 %v1000_v40 }
  0xf6   : > { %2307 = vmatmul.msk.bf16.gmra.mxu0 %vm542_vm1, %v3033_v35  ;;  %v808_v9 = vadd.f32 %v783_v3, %v722_v61 }
  0xf7   : > { %v3076_v53 = vpack.c.b16 %v1019_v0, %v1018_v26  ;;  %v1235_v0 = vsel %vm2930_vm7, %v1233_v56, %v1234_v50 }
  0xf8   : > { %2325 = vmatmul.msk.bf16.gmra.mxu2 %vm542_vm1, %v2891_v60  ;;  %2316 = vmatmul.msk.bf16.gmra.mxu1 %vm542_vm1, %v2852_v58 }
  0xf9   : > { %2334 = vmatmul.msk.bf16.gmra.mxu3 %vm542_vm1, %v3054_v45 }
  0xfb   : > { %v607_v18 = vpop.f32.mrf.mxu0  ;;  %v788_v15 = vpop.f32.mrf.mxu2 }
  0xfc   : > { %v883_v1 = vpop.f32.mrf.mxu3  ;;  %v724_v21 = vadd.f32 %v723_v30, %v607_v18  ;;  %v1714_v18 = vsel %vm567_vm0, %v2378_v36, 0 }
  0xfd   : > { %v3067_v31 = vadd.f32 %v883_v1, %v808_v9  ;;  %v728_v3 = vpop.f32.mrf.mxu1  ;;  %v2328_v9 = vrot.slane %v2870_v63, 9  ;;  %v2377_v63 = vld [vmem:[%s3566_s2 + $0x18] sm:$0x3]  ;;  %1723 = vmatpush.bf16.msrb.mxu0 %v1714_v18 }
  0xfe   : > { %v809_v24 = vadd.f32 %v785_v11, %v724_v21  ;;  %v2395_v11 = vld [vmem:[%s3566_s2 + $0x1c] sm:$0x3]  ;;  %v1766_v1 = vsel %vm567_vm0, %v2377_v63, 0 }
  0xff   : > { %1775 = vmatpush.bf16.msrb.mxu1 %v1766_v1  ;;  %v1232_v48 = vsel %vm2930_vm7, %v2328_v9, %v1231_v34 }
 0x103   : > { %v610_v28 = vpop.f32.mrf.mxu0  ;;  %v790_v57 = vpop.f32.mrf.mxu2 }
 0x104   : > { %v885_v32 = vpop.f32.mrf.mxu3  ;;  %v727_v33 = vadd.f32 %v726_v62, %v610_v28  ;;  %v1820_v62 = vsel %vm567_vm0, %v2395_v11, 0 }
 0x105   : > { %v3074_v30 = vadd.f32 %v885_v32, %v809_v24  ;;  %v731_v61 = vpop.f32.mrf.mxu1  ;;  %1829 = vmatpush.bf16.msrb.mxu2 %v1820_v62  ;;  %v1236_v32 = vunpack.c.l.b16 %v1232_v48 }
 0x106   : > { %2308 = vmatmul.msk.bf16.gmra.mxu0 %vm542_vm1, %v3054_v45  ;;  %v810_v43 = vadd.f32 %v788_v15, %v727_v33  ;;  %v1237_v33 = vunpack.c.l.b16 %v1235_v0 }
 0x108   : > { %2326 = vmatmul.msk.bf16.gmra.mxu2 %vm542_vm1, %v2923_v49  ;;  %2317 = vmatmul.msk.bf16.gmra.mxu1 %vm542_vm1, %v2891_v60 }
 0x109   : > { %2335 = vmatmul.msk.bf16.gmra.mxu3 %vm542_vm1, %v3076_v53 }
 0x10b   : > { %v612_v21 = vpop.f32.mrf.mxu0  ;;  %v793_v40 = vpop.f32.mrf.mxu2 }
 0x10c   : > { %v888_v15 = vpop.f32.mrf.mxu3  ;;  %v729_v24 = vadd.f32 %v728_v3, %v612_v21  ;;  %v3112_v3 = vpack.c.b16 %v1237_v33, %v1236_v32  ;;  %v3137_v32 = vld [vmem:[%s3567_s3] ss:$0 sm:$0xff] }
 0x10d   : > { %v3104_v38 = vadd.f32 %v888_v15, %v810_v43  ;;  %v733_v28 = vpop.f32.mrf.mxu1 }
 0x10e   : > { %v811_v26 = vadd.f32 %v790_v57, %v729_v24 }
 0x113   : > { %v615_v11 = vpop.f32.mrf.mxu0  ;;  %v795_v36 = vpop.f32.mrf.mxu2 }
 0x114   : > { %v890_v62 = vpop.f32.mrf.mxu3  ;;  %v732_v5 = vadd.f32 %v731_v61, %v615_v11 }
 0x115   : > { %v3110_v63 = vadd.f32 %v890_v62, %v811_v26  ;;  %v1116_v43 = vpop.f32.mrf.mxu1 }
 0x116   : > { %2309 = vmatmul.msk.bf16.gmra.mxu0 %vm542_vm1, %v3076_v53  ;;  %v812_v57 = vadd.f32 %v793_v40, %v732_v5 }
 0x118   : > { %2360 = vmatmul.msk.bf16.vlgmr.msra.gmra.mxu2 %vm542_vm1, %v2697_v8  ;;  %2347 = vmatmul.msk.bf16.vlgmr.msra.gmra.mxu1 %vm542_vm1, %v2626_v16 }
 0x119   : > { %2336 = vmatmul.msk.bf16.gmra.mxu3 %vm542_vm1, %v3112_v3 }
 0x11b   : > { %v617_v34 = vpop.f32.mrf.mxu0  ;;  %v1170_v56 = vpop.f32.mrf.mxu2 }
 0x11c   : > { %v893_v61 = vpop.f32.mrf.mxu3  ;;  %v734_v9 = vadd.f32 %v733_v28, %v617_v34 }
 0x11d   : > { %v3122_v50 = vadd.f32 %v893_v61, %v812_v57  ;;  %v1118_v18 = vpop.f32.mrf.mxu1 }
 0x11e   : > { %v813_v29 = vadd.f32 %v795_v36, %v734_v9 }
 0x123   : > { %v1064_v1 = vpop.f32.mrf.mxu0  ;;  %v1172_v15 = vpop.f32.mrf.mxu2 }
 0x124   : > { %v895_v21 = vpop.f32.mrf.mxu3  ;;  %v1117_v40 = vadd.f32 %v1116_v43, %v1064_v1 }
 0x125   : > { %v3124_v24 = vadd.f32 %v895_v21, %v813_v29  ;;  %v1121_v26 = vpop.f32.mrf.mxu1 }
 0x126   : > { %2339 = vmatmul.msk.bf16.vlgmr.msra.gmra.mxu0 %vm542_vm1, %v2702_v12  ;;  %v1210_v16 = vadd.f32 %v1170_v56, %v1117_v40 }
 0x127   : > { %v932_v6 = vadd.f32 %v3137_v32, %v3124_v24 }
 0x128   : > { %2361 = vmatmul.msk.bf16.gmra.mxu2 %vm542_vm1, %v2730_v42  ;;  %2348 = vmatmul.msk.bf16.gmra.mxu1 %vm542_vm1, %v2697_v8 }
 0x129   : > { %2369 = vmatmul.msk.bf16.vlgmr.msra.gmra.mxu3 %vm542_vm1, %v2727_v41 }
 0x12b   : > { %v1066_v48 = vpop.f32.mrf.mxu0  ;;  %v1175_v28 = vpop.f32.mrf.mxu2 }
 0x12c   : > { %v1254_v0 = vpop.f32.mrf.mxu3  ;;  %v1119_v11 = vadd.f32 %v1118_v18, %v1066_v48 }
 0x12d   : > { %v1294_v33 = vadd.f32 %v1254_v0, %v1210_v16  ;;  %v1123_v5 = vpop.f32.mrf.mxu1 }
 0x12e   : > { %v1211_v36 = vadd.f32 %v1172_v15, %v1119_v11 }
 0x12f   : > { %v1310_v62 = vadd.f32 %v3137_v32, %v1294_v33 }
 0x131   : > { %1342 = vrot.lane.b32.xlu0 %v1310_v62, %s2515_s10 }
 0x133   : > { %v1069_v57 = vpop.f32.mrf.mxu0  ;;  %v1177_v8 = vpop.f32.mrf.mxu2 }
 0x134   : > { %v1256_v43 = vpop.f32.mrf.mxu3  ;;  %v1122_v61 = vadd.f32 %v1121_v26, %v1069_v57 }
 0x135   : > { %v1295_v34 = vadd.f32 %v1256_v43, %v1211_v36  ;;  %v1126_v56 = vpop.f32.mrf.mxu1 }
 0x136   : > { %2340 = vmatmul.msk.bf16.gmra.mxu0 %vm542_vm1, %v2727_v41  ;;  %v1212_v29 = vadd.f32 %v1175_v28, %v1122_v61 }
 0x137   : > { %v1311_v9 = vadd.f32 %v3137_v32, %v1295_v34 }
 0x138   : > { %2362 = vmatmul.msk.bf16.gmra.mxu2 %vm542_vm1, %v2761_v4  ;;  %2349 = vmatmul.msk.bf16.gmra.mxu1 %vm542_vm1, %v2730_v42 }
 0x139   : > { %2370 = vmatmul.msk.bf16.gmra.mxu3 %vm542_vm1, %v2758_v2  ;;  %1344 = vrot.lane.b32.xlu0 %v1311_v9, %s2515_s10 }
 0x13b   : > { %v1071_v18 = vpop.f32.mrf.mxu0  ;;  %v1180_v21 = vpop.f32.mrf.mxu2 }
 0x13c   : > { %v1259_v1 = vpop.f32.mrf.mxu3  ;;  %v1124_v40 = vadd.f32 %v1123_v5, %v1071_v18 }
 0x13d   : > { %v1296_v15 = vadd.f32 %v1259_v1, %v1212_v29  ;;  %v1128_v16 = vpop.f32.mrf.mxu1 }
 0x13e   : > { %v1213_v48 = vadd.f32 %v1177_v8, %v1124_v40 }
 0x13f   : > { %v1312_v26 = vadd.f32 %v3137_v32, %v1296_v15 }
 0x141   : > { %1346 = vrot.lane.b32.xlu1 %v1312_v26, %s2515_s10 }
 0x143   : > { %v1074_v0 = vpop.f32.mrf.mxu0  ;;  %v1182_v28 = vpop.f32.mrf.mxu2 }
 0x144   : > { %v1261_v33 = vpop.f32.mrf.mxu3  ;;  %v1127_v62 = vadd.f32 %v1126_v56, %v1074_v0 }
 0x145   : > { %v1297_v11 = vadd.f32 %v1261_v33, %v1213_v48  ;;  %v1131_v36 = vpop.f32.mrf.mxu1 }
 0x146   : > { %2341 = vmatmul.msk.bf16.gmra.mxu0 %vm542_vm1, %v2758_v2  ;;  %v1214_v5 = vadd.f32 %v1180_v21, %v1127_v62 }
 0x147   : > { %v1313_v42 = vadd.f32 %v3137_v32, %v1297_v11 }
 0x148   : > { %2363 = vmatmul.msk.bf16.gmra.mxu2 %vm542_vm1, %v2793_v47  ;;  %2350 = vmatmul.msk.bf16.gmra.mxu1 %vm542_vm1, %v2761_v4 }
 0x149   : > { %2371 = vmatmul.msk.bf16.gmra.mxu3 %vm542_vm1, %v2790_v46  ;;  %1348 = vrot.lane.b32.xlu1 %v1313_v42, %s2515_s10 }
 0x14b   : > { %v1076_v57 = vpop.f32.mrf.mxu0  ;;  %v1185_v8 = vpop.f32.mrf.mxu2 }
 0x14c   : > { %v1264_v43 = vpop.f32.mrf.mxu3  ;;  %v1129_v61 = vadd.f32 %v1128_v16, %v1076_v57 }
 0x14d   : > { %v1298_v34 = vadd.f32 %v1264_v43, %v1214_v5  ;;  %v1133_v56 = vpop.f32.mrf.mxu1 }
 0x14e   : > { %v1215_v29 = vadd.f32 %v1182_v28, %v1129_v61 }
 0x14f   : > { %v1314_v9 = vadd.f32 %v3137_v32, %v1298_v34 }
 0x151   : > { %1350 = vrot.lane.b32.xlu2 %v1314_v9, %s2515_s10 }
 0x153   : > { %v1079_v18 = vpop.f32.mrf.mxu0  ;;  %v1187_v21 = vpop.f32.mrf.mxu2 }
 0x154   : > { %v1266_v1 = vpop.f32.mrf.mxu3  ;;  %v1132_v40 = vadd.f32 %v1131_v36, %v1079_v18 }
 0x155   : > { %v1299_v15 = vadd.f32 %v1266_v1, %v1215_v29  ;;  %v1136_v26 = vpop.f32.mrf.mxu1 }
 0x156   : > { %2342 = vmatmul.msk.bf16.gmra.mxu0 %vm542_vm1, %v2790_v46  ;;  %v1216_v16 = vadd.f32 %v1185_v8, %v1132_v40 }
 0x157   : > { %v1315_v4 = vadd.f32 %v3137_v32, %v1299_v15 }
 0x158   : > { %2364 = vmatmul.msk.bf16.gmra.mxu2 %vm542_vm1, %v2823_v14  ;;  %2351 = vmatmul.msk.bf16.gmra.mxu1 %vm542_vm1, %v2793_v47 }
 0x159   : > { %2372 = vmatmul.msk.bf16.gmra.mxu3 %vm542_vm1, %v2820_v13  ;;  %1352 = vrot.lane.b32.xlu2 %v1315_v4, %s2515_s10 }
 0x15b   : > { %v1081_v48 = vpop.f32.mrf.mxu0  ;;  %v1190_v33 = vpop.f32.mrf.mxu2 }
 0x15c   : > { %v1269_v0 = vpop.f32.mrf.mxu3  ;;  %v1134_v62 = vadd.f32 %v1133_v56, %v1081_v48 }
 0x15d   : > { %v1300_v28 = vadd.f32 %v1269_v0, %v1216_v16  ;;  %v1138_v42 = vpop.f32.mrf.mxu1 }
 0x15e   : > { %v1217_v36 = vadd.f32 %v1187_v21, %v1134_v62 }
 0x15f   : > { %v1316_v11 = vadd.f32 %v3137_v32, %v1300_v28 }
 0x161   : > { %1354 = vrot.lane.b32.xlu0 %v1316_v11, %s2515_s10 }
 0x163   : > { %v1084_v5 = vpop.f32.mrf.mxu0  ;;  %v1192_v43 = vpop.f32.mrf.mxu2 }
 0x164   : > { %v1271_v57 = vpop.f32.mrf.mxu3  ;;  %v1137_v34 = vadd.f32 %v1136_v26, %v1084_v5 }
 0x165   : > { %v1301_v8 = vadd.f32 %v1271_v57, %v1217_v36  ;;  %v1141_v61 = vpop.f32.mrf.mxu1  ;;  %v3203_v36 = vld [vmem:[%s2863_s9 + $0x10] sm:$0xf] }
 0x166   : > { %2343 = vmatmul.msk.bf16.gmra.mxu0 %vm542_vm1, %v2820_v13  ;;  %v1218_v9 = vadd.f32 %v1190_v33, %v1137_v34 }
 0x167   : > { %v1317_v47 = vadd.f32 %v3137_v32, %v1301_v8 }
 0x168   : > { %2365 = vmatmul.msk.bf16.gmra.mxu2 %vm542_vm1, %v2855_v59  ;;  %2352 = vmatmul.msk.bf16.gmra.mxu1 %vm542_vm1, %v2823_v14 }
 0x169   : > { %2373 = vmatmul.msk.bf16.gmra.mxu3 %vm542_vm1, %v2852_v58  ;;  %1356 = vrot.lane.b32.xlu1 %v1317_v47, %s2515_s10  ;;  %v1605_v47 = vshll.u32 %v3203_v36, 16 }
 0x16b   : > { %v1086_v56 = vpop.f32.mrf.mxu0  ;;  %v1195_v18 = vpop.f32.mrf.mxu2 }
 0x16c   : > { %v1274_v29 = vpop.f32.mrf.mxu3  ;;  %v1139_v15 = vadd.f32 %v1138_v42, %v1086_v56  ;;  %v3200_v42 = vld [vmem:[%s2863_s9 + $0xc] sm:$0xf] }
 0x16d   : > { %v1302_v1 = vadd.f32 %v1274_v29, %v1218_v9  ;;  %v1143_v40 = vpop.f32.mrf.mxu1  ;;  %v1596_v8 = vshrl.u32 %v3200_v42, 16  ;;  %v1599_v34 = vshll.u32 %v3200_v42, 16 }
 0x16e   : > { %v1219_v4 = vadd.f32 %v1192_v43, %v1139_v15 }
 0x16f   : > { %v1318_v21 = vadd.f32 %v3137_v32, %v1302_v1  ;;  %v1598_v29 = vrot.slane %v1596_v8, 4  ;;  %v1607_v1 = vrot.slane %v1605_v47, 5 }
 0x171   : > { %1358 = vrot.lane.b32.xlu2 %v1318_v21, %s2515_s10 }
 0x173   : > { %v1089_v26 = vpop.f32.mrf.mxu0  ;;  %v1197_v48 = vpop.f32.mrf.mxu2 }
 0x174   : > { %v1276_v16 = vpop.f32.mrf.mxu3  ;;  %v1142_v33 = vadd.f32 %v1141_v61, %v1089_v26  ;;  %v1609_v61 = vshrl.u32 %v3203_v36, 16  ;;  %v3212_v26 = vld [vmem:[%s2863_s9 + $0x14] sm:$0x1] }
 0x175   : > { %v1303_v0 = vadd.f32 %v1276_v16, %v1219_v4  ;;  %v1146_v28 = vpop.f32.mrf.mxu1 }
 0x176   : > { %2344 = vmatmul.msk.bf16.gmra.mxu0 %vm542_vm1, %v2852_v58  ;;  %v1220_v11 = vadd.f32 %v1195_v18, %v1142_v33  ;;  %v1601_v18 = vrot.slane %v1599_v34, 5  ;;  %v1611_v21 = vrot.slane %v1609_v61, 4 }
 0x177   : > { %v1319_v14 = vadd.f32 %v3137_v32, %v1303_v0 }
 0x178   : > { %2366 = vmatmul.msk.bf16.gmra.mxu2 %vm542_vm1, %v2894_v55  ;;  %2353 = vmatmul.msk.bf16.gmra.mxu1 %vm542_vm1, %v2855_v59 }
 0x179   : > { %2374 = vmatmul.msk.bf16.gmra.mxu3 %vm542_vm1, %v2891_v60  ;;  %1360 = vrot.lane.b32.xlu0 %v1319_v14, %s2515_s10 }
 0x17b   : > { %v1091_v62 = vpop.f32.mrf.mxu0  ;;  %v1200_v57 = vpop.f32.mrf.mxu2 }
 0x17c   : > { %v1279_v5 = vpop.f32.mrf.mxu3  ;;  %v1144_v59 = vadd.f32 %v1143_v40, %v1091_v62  ;;  %v1602_v40 = vor.u32 %v1601_v18, %v1598_v29  ;;  %v1612_v62 = vor.u32 %v1611_v21, %v1607_v1 }
 0x17d   : > { %v1304_v43 = vadd.f32 %v1279_v5, %v1220_v11  ;;  %v1148_v56 = vpop.f32.mrf.mxu1  ;;  %v2428_v11 = vld [vmem:[%s2863_s9 + $0xc] sm:$0xff]  ;;  %v1615_v5 = vshll.u32 %v3212_v26, 16  ;;  %s2217_s9 = sshll.u32 %s2501_s16, 1 }
 0x17e   : > { %v1221_v15 = vadd.f32 %v1197_v48, %v1144_v59  ;;  %v1613_v34 = vrot.slane %v1612_v62, 4  ;;  %s278_s11 = sadd.s32 %s2497_s15, %s2217_s9 }
 0x17f   : > { %v1320_v9 = vadd.f32 %v3137_v32, %v1304_v43  ;;  %v1617_v47 = vrot.slane %v1615_v5, 5  ;;  %s2218_s12 = sshll.u32 %s278_s11, 4 }
 0x180   : > { %p280_p8 = scmp.lt.s32.totalorder %s2218_s12, 191 }
 0x181   : > { %1362 = vrot.lane.b32.xlu1 %v1320_v9, %s2515_s10  ;;  %v1618_v21 = vsel %vm2667_vm4, %v1613_v34, %v1617_v47 }
 0x182   : > { %s3586_s12 = smov (!%p280_p8, %s2218_s12), 191 }
 0x183   : > { %v1094_v4 = vpop.f32.mrf.mxu0  ;;  %v1202_v0 = vpop.f32.mrf.mxu2  ;;  %s2418_s15 = sshll.u32 %s3586_s12, 4 }
 0x184   : > { %v1281_v16 = vpop.f32.mrf.mxu3  ;;  %v1147_v14 = vadd.f32 %v1146_v28, %v1094_v4  ;;  %v1603_v28 = vrot.slane %v1602_v40, 4  ;;  %s3252_s14 = scalar_lea.vmem %s3568_s4, %s2418_s15 }
 0x185   : > { %v1305_v33 = vadd.f32 %v1281_v16, %v1221_v15  ;;  %v1151_v8 = vpop.f32.mrf.mxu1  ;;  %v1620_v16 = vunpack.c.l.b16 %v1618_v21 }
 0x186   : > { %2345 = vmatmul.msk.bf16.gmra.mxu0 %vm542_vm1, %v2891_v60  ;;  %v1222_v48 = vadd.f32 %v1200_v57, %v1147_v14  ;;  %v1608_v18 = vsel %vm2667_vm4, %v1603_v28, %v1607_v1 }
 0x187   : > { %v1321_v43 = vadd.f32 %v3137_v32, %v1305_v33 }
 0x188   : > { %2367 = vmatmul.msk.bf16.gmra.mxu2 %vm542_vm1, %v2428_v11  ;;  %2354 = vmatmul.msk.bf16.gmra.mxu1 %vm542_vm1, %v2894_v55  ;;  %v1619_v55 = vunpack.c.l.b16 %v1608_v18 }
 0x189   : > { %2375 = vmatmul.msk.bf16.gmra.mxu3 %vm542_vm1, %v2923_v49  ;;  %1364 = vrot.lane.b32.xlu2 %v1321_v43, %s2515_s10 }
 0x18a   : > { %v3233_v5 = vpack.c.b16 %v1620_v16, %v1619_v55 }
 0x18b   : > { %v1096_v61 = vpop.f32.mrf.mxu0  ;;  %v1205_v59 = vpop.f32.mrf.mxu2 }
 0x18c   : > { %v1284_v9 = vpop.f32.mrf.mxu3  ;;  %v1149_v15 = vadd.f32 %v1148_v56, %v1096_v61 }
 0x18d   : > { %v1306_v29 = vadd.f32 %v1284_v9, %v1222_v48  ;;  %v1153_v4 = vpop.f32.mrf.mxu1  ;;  %v917_v9 = vadd.f32 %v3137_v32, %v2962_v44 }
 0x18e   : > { %v1223_v33 = vadd.f32 %v1202_v0, %v1149_v15 }
 0x18f   : > { %v1322_v57 = vadd.f32 %v3137_v32, %v1306_v29 }
 0x191   : > { %1366 = vrot.lane.b32.xlu0 %v1322_v57, %s2515_s10 }
 0x193   : > { %v1099_v14 = vpop.f32.mrf.mxu0  ;;  %v1207_v40 = vpop.f32.mrf.mxu2 }
 0x194   : > { %v1286_v11 = vpop.f32.mrf.mxu3  ;;  %v1152_v1 = vadd.f32 %v1151_v8, %v1099_v14  ;;  %v921_v14 = vadd.f32 %v3137_v32, %v3004_v51 }
 0x195   : > { %v1307_v62 = vadd.f32 %v1286_v11, %v1223_v33  ;;  %v1475_v56 = vpop.f32.mrf.mxu1  ;;  %v918_v33 = vadd.f32 %v3137_v32, %v2968_v27 }
 0x196   : > { %2346 = vmatmul.msk.bf16.gmra.mxu0 %vm542_vm1, %v2923_v49  ;;  %v1224_v0 = vadd.f32 %v1205_v59, %v1152_v1 }
 0x197   : > { %v1323_v39 = vadd.f32 %v3137_v32, %v1307_v62 }
 0x198   : > { %2396 = vmatmul.msk.bf16.vlgmr.msrb.gmra.mxu2 %vm542_vm1, %v2727_v41  ;;  %2387 = vmatmul.msk.bf16.vlgmr.msrb.gmra.mxu1 %vm542_vm1, %v2702_v12 }
 0x199   : > { %2376 = vmatmul.msk.bf16.gmra.mxu3 %vm542_vm1, %v3233_v5  ;;  %1368 = vrot.lane.b32.xlu1 %v1323_v39, %s2515_s10 }
 0x19b   : > { %v1101_v43 = vpop.f32.mrf.mxu0  ;;  %v1537_v48 = vpop.f32.mrf.mxu2 }
 0x19c   : > { %v1289_v8 = vpop.f32.mrf.mxu3  ;;  %v1154_v47 = vadd.f32 %v1153_v4, %v1101_v43  ;;  %v919_v43 = vadd.f32 %v3137_v32, %v2983_v22 }
 0x19d   : > { %v1308_v28 = vadd.f32 %v1289_v8, %v1224_v0  ;;  %v1477_v61 = vpop.f32.mrf.mxu1  ;;  %v922_v8 = vadd.f32 %v3137_v32, %v3010_v7 }
 0x19e   : > { %v1225_v59 = vadd.f32 %v1207_v40, %v1154_v47 }
 0x19f   : > { %v1324_v34 = vadd.f32 %v3137_v32, %v1308_v28 }
 0x1a1   : > { %1370 = vrot.lane.b32.xlu2 %v1324_v34, %s2515_s10 }
 0x1a3   : > { %v1343_v12 = vpop.permute.xlu0 %1342  ;;  %v1423_v29 = vpop.f32.mrf.mxu0 }
 0x1a4   : > { %v1391_v18 = vsel %vm1390_vm8, %v917_v9, %v1343_v12  ;;  %v1291_v21 = vpop.f32.mrf.mxu3  ;;  %v1476_v57 = vadd.f32 %v1475_v56, %v1423_v29  ;;  %v1539_v15 = vpop.f32.mrf.mxu2 }
 0x1a5   : > { %2068 = vst.msk [vmem:[%s3252_s14] sm:$0xff] %vm2067_vm9, %v1391_v18  ;;  %v1309_v4 = vadd.f32 %v1291_v21, %v1225_v59  ;;  %v1480_v16 = vpop.f32.mrf.mxu1  ;;  %v920_v18 = vadd.f32 %v3137_v32, %v2989_v25 }
 0x1a6   : > { %2379 = vmatmul.msk.bf16.vlgmr.msrb.gmra.mxu0 %vm542_vm1, %v2950_v37  ;;  %v1577_v44 = vadd.f32 %v1537_v48, %v1476_v57 }
 0x1a7   : > { %v1325_v55 = vadd.f32 %v3137_v32, %v1309_v4 }
 0x1a8   : > { %2397 = vmatmul.msk.bf16.gmra.mxu2 %vm542_vm1, %v2758_v2  ;;  %2388 = vmatmul.msk.bf16.gmra.mxu1 %vm542_vm1, %v2727_v41 }
 0x1a9   : > { %2406 = vmatmul.msk.bf16.vlgmr.msrb.gmra.mxu3 %vm542_vm1, %v2970_v17  ;;  %1372 = vrot.lane.b32.xlu0 %v1325_v55, %s2515_s10 }
 0x1ab   : > { %v1345_v37 = vpop.permute.xlu0 %1344  ;;  %v1351_v11 = vpop.permute.xlu2 %1350 }
 0x1ac   : > { %v1392_v40 = vsel %vm1390_vm8, %v918_v33, %v1345_v37  ;;  %v1395_v62 = vsel %vm1390_vm8, %v921_v14, %v1351_v11  ;;  %v1637_v1 = vpop.f32.mrf.mxu3  ;;  %v1425_v39 = vpop.f32.mrf.mxu0 }
 0x1ad   : > { %2069 = vst.msk [vmem:[%s3252_s14 + $0x8] sm:$0xff] %vm2067_vm9, %v1392_v40  ;;  %v3275_v27 = vadd.f32 %v1637_v1, %v1577_v44  ;;  %v1478_v51 = vadd.f32 %v1477_v61, %v1425_v39  ;;  %v1542_v56 = vpop.f32.mrf.mxu2  ;;  %v1482_v41 = vpop.f32.mrf.mxu1  ;;  %v925_v1 = vadd.f32 %v3137_v32, %v3046_v54 }
 0x1ae   : > { %2076 = vst.msk [vmem:[%s3252_s14 + $0x40] sm:$0xff] %vm2067_vm9, %v1395_v62 }
 0x1af   : > { %v1578_v0 = vadd.f32 %v1539_v15, %v1478_v51 }
 0x1b3   : > { %v1347_v48 = vpop.permute.xlu1 %1346  ;;  %v1353_v28 = vpop.permute.xlu2 %1352 }
 0x1b4   : > { %v1393_v34 = vsel %vm1390_vm8, %v919_v43, %v1347_v48  ;;  %v1396_v47 = vsel %vm1390_vm8, %v922_v8, %v1353_v28  ;;  %v1639_v9 = vpop.f32.mrf.mxu3  ;;  %v1428_v61 = vpop.f32.mrf.mxu0  ;;  %v923_v48 = vadd.f32 %v3137_v32, %v3025_v10  ;;  %v924_v10 = vadd.f32 %v3137_v32, %v3031_v19 }
 0x1b5   : > { %2072 = vst.msk [vmem:[%s3252_s14 + $0x20] sm:$0xff] %vm2067_vm9, %v1393_v34  ;;  %v3287_v12 = vadd.f32 %v1639_v9, %v1578_v0  ;;  %v1481_v59 = vadd.f32 %v1480_v16, %v1428_v61  ;;  %v1544_v29 = vpop.f32.mrf.mxu2  ;;  %v1485_v7 = vpop.f32.mrf.mxu1 }
 0x1b6   : > { %2077 = vst.msk [vmem:[%s3252_s14 + $0x48] sm:$0xff] %vm2067_vm9, %v1396_v47  ;;  %2380 = vmatmul.msk.bf16.gmra.mxu0 %vm542_vm1, %v2970_v17 }
 0x1b7   : > { %v1579_v22 = vadd.f32 %v1542_v56, %v1481_v59 }
 0x1b8   : > { %2398 = vmatmul.msk.bf16.gmra.mxu2 %vm542_vm1, %v2790_v46  ;;  %2389 = vmatmul.msk.bf16.gmra.mxu1 %vm542_vm1, %v2758_v2 }
 0x1b9   : > { %2407 = vmatmul.msk.bf16.gmra.mxu3 %vm542_vm1, %v2991_v23 }
 0x1bb   : > { %v1349_v21 = vpop.permute.xlu1 %1348 }
 0x1bc   : > { %v1394_v57 = vsel %vm1390_vm8, %v920_v18, %v1349_v21  ;;  %v1642_v15 = vpop.f32.mrf.mxu3  ;;  %v1430_v4 = vpop.f32.mrf.mxu0 }
 0x1bd   : > { %2073 = vst.msk [vmem:[%s3252_s14 + $0x28] sm:$0xff] %vm2067_vm9, %v1394_v57  ;;  %v3304_v17 = vadd.f32 %v1642_v15, %v1579_v22  ;;  %v1483_v44 = vadd.f32 %v1482_v41, %v1430_v4  ;;  %v1547_v55 = vpop.f32.mrf.mxu2  ;;  %v1487_v33 = vpop.f32.mrf.mxu1 }
 0x1bf   : > { %v1580_v16 = vadd.f32 %v1544_v29, %v1483_v44 }
 0x1c4   : > { %v1644_v25 = vpop.f32.mrf.mxu3  ;;  %v1433_v14 = vpop.f32.mrf.mxu0 }
 0x1c5   : > { %v3306_v37 = vadd.f32 %v1644_v25, %v1580_v16  ;;  %v1486_v11 = vadd.f32 %v1485_v7, %v1433_v14  ;;  %v1549_v2 = vpop.f32.mrf.mxu2  ;;  %v1490_v62 = vpop.f32.mrf.mxu1 }
 0x1c6   : > { %2381 = vmatmul.msk.bf16.gmra.mxu0 %vm542_vm1, %v2991_v23 }
 0x1c7   : > { %v1581_v40 = vadd.f32 %v1547_v55, %v1486_v11  ;;  %v928_v55 = vadd.f32 %v3137_v32, %v3074_v30  ;;  %v926_v30 = vadd.f32 %v3137_v32, %v3052_v52 }
 0x1c8   : > { %2399 = vmatmul.msk.bf16.gmra.mxu2 %vm542_vm1, %v2820_v13  ;;  %2390 = vmatmul.msk.bf16.gmra.mxu1 %vm542_vm1, %v2790_v46 }
 0x1c9   : > { %2408 = vmatmul.msk.bf16.gmra.mxu3 %vm542_vm1, %v3012_v20 }
 0x1cb   : > { %v1359_v39 = vpop.permute.xlu2 %1358 }
 0x1cc   : > { %v1399_v51 = vsel %vm1390_vm8, %v925_v1, %v1359_v39  ;;  %v1647_v56 = vpop.f32.mrf.mxu3  ;;  %v1435_v23 = vpop.f32.mrf.mxu0 }
 0x1cd   : > { %2084 = vst.msk [vmem:[%s3252_s14 + $0x80] sm:$0xff] %vm2067_vm9, %v1399_v51  ;;  %v3321_v0 = vadd.f32 %v1647_v56, %v1581_v40  ;;  %v1488_v41 = vadd.f32 %v1487_v33, %v1435_v23  ;;  %v1552_v43 = vpop.f32.mrf.mxu2  ;;  %v1492_v54 = vpop.f32.mrf.mxu1 }
 0x1cf   : > { %v1582_v8 = vadd.f32 %v1549_v2, %v1488_v41 }
 0x1d3   : > { %v1355_v28 = vpop.permute.xlu0 %1354 }
 0x1d4   : > { %v1397_v46 = vsel %vm1390_vm8, %v923_v48, %v1355_v28  ;;  %v1649_v34 = vpop.f32.mrf.mxu3  ;;  %v1438_v47 = vpop.f32.mrf.mxu0 }
 0x1d5   : > { %2080 = vst.msk [vmem:[%s3252_s14 + $0x60] sm:$0xff] %vm2067_vm9, %v1397_v46  ;;  %v3328_v9 = vadd.f32 %v1649_v34, %v1582_v8  ;;  %v1491_v61 = vadd.f32 %v1490_v62, %v1438_v47  ;;  %v1554_v59 = vpop.f32.mrf.mxu2  ;;  %v1495_v22 = vpop.f32.mrf.mxu1  ;;  %v927_v8 = vadd.f32 %v3137_v32, %v3067_v31  ;;  %v931_v31 = vadd.f32 %v3137_v32, %v3122_v50 }
 0x1d6   : > { %2382 = vmatmul.msk.bf16.gmra.mxu0 %vm542_vm1, %v3012_v20 }
 0x1d7   : > { %v1583_v29 = vadd.f32 %v1552_v43, %v1491_v61 }
 0x1d8   : > { %2400 = vmatmul.msk.bf16.gmra.mxu2 %vm542_vm1, %v2852_v58  ;;  %2391 = vmatmul.msk.bf16.gmra.mxu1 %vm542_vm1, %v2820_v13 }
 0x1d9   : > { %2409 = vmatmul.msk.bf16.gmra.mxu3 %vm542_vm1, %v3033_v35 }
 0x1db   : > { %v1357_v7 = vpop.permute.xlu1 %1356 }
 0x1dc   : > { %v1398_v18 = vsel %vm1390_vm8, %v924_v10, %v1357_v7  ;;  %v1652_v21 = vpop.f32.mrf.mxu3  ;;  %v1440_v20 = vpop.f32.mrf.mxu0 }
 0x1dd   : > { %2081 = vst.msk [vmem:[%s3252_s14 + $0x68] sm:$0xff] %vm2067_vm9, %v1398_v18  ;;  %v3343_v57 = vadd.f32 %v1652_v21, %v1583_v29  ;;  %v1493_v15 = vadd.f32 %v1492_v54, %v1440_v20  ;;  %v1557_v4 = vpop.f32.mrf.mxu2  ;;  %v1497_v19 = vpop.f32.mrf.mxu1 }
 0x1df   : > { %v1584_v44 = vadd.f32 %v1554_v59, %v1493_v15  ;;  %v929_v15 = vadd.f32 %v3137_v32, %v3104_v38  ;;  %v930_v38 = vadd.f32 %v3137_v32, %v3110_v63 }
 0x1e3   : > { %v1365_v16 = vpop.permute.xlu2 %1364 }
 0x1e4   : > { %v1402_v13 = vsel %vm1390_vm8, %v928_v55, %v1365_v16  ;;  %v1654_v33 = vpop.f32.mrf.mxu3  ;;  %v1443_v25 = vpop.f32.mrf.mxu0 }
 0x1e5   : > { %2089 = vst.msk [vmem:[%s3252_s14 + $0xa8] sm:$0xff] %vm2067_vm9, %v1402_v13  ;;  %v3350_v14 = vadd.f32 %v1654_v33, %v1584_v44  ;;  %v1496_v11 = vadd.f32 %v1495_v22, %v1443_v25  ;;  %v1559_v2 = vpop.f32.mrf.mxu2  ;;  %v1500_v62 = vpop.f32.mrf.mxu1  ;;  %v1892_v33 = vrot.slane %v3203_v36, 5 }
 0x1e6   : > { %2383 = vmatmul.msk.bf16.gmra.mxu0 %vm542_vm1, %v3033_v35 }
 0x1e7   : > { %v1585_v40 = vadd.f32 %v1557_v4, %v1496_v11 }
 0x1e8   : > { %2401 = vmatmul.msk.bf16.gmra.mxu2 %vm542_vm1, %v2891_v60  ;;  %2392 = vmatmul.msk.bf16.gmra.mxu1 %vm542_vm1, %v2852_v58 }
 0x1e9   : > { %2410 = vmatmul.msk.bf16.gmra.mxu3 %vm542_vm1, %v3054_v45 }
 0x1eb   : > { %v1361_v1 = vpop.permute.xlu0 %1360 }
 0x1ec   : > { %v1400_v39 = vsel %vm1390_vm8, %v926_v30, %v1361_v1  ;;  %v1657_v51 = vpop.f32.mrf.mxu3  ;;  %v1445_v35 = vpop.f32.mrf.mxu0 }
 0x1ed   : > { %2085 = vst.msk [vmem:[%s3252_s14 + $0x88] sm:$0xff] %vm2067_vm9, %v1400_v39  ;;  %v3365_v56 = vadd.f32 %v1657_v51, %v1585_v40  ;;  %v1498_v23 = vadd.f32 %v1497_v19, %v1445_v35  ;;  %v1562_v41 = vpop.f32.mrf.mxu2  ;;  %v1502_v52 = vpop.f32.mrf.mxu1  ;;  %v1894_v40 = vrot.slane %v1892_v33, 4 }
 0x1ef   : > { %v1586_v43 = vadd.f32 %v1559_v2, %v1498_v23  ;;  %v2405_v2 = vrot.slane %v3200_v42, 9 }
 0x1f3   : > { %v1363_v54 = vpop.permute.xlu1 %1362 }
 0x1f4   : > { %v1401_v58 = vsel %vm1390_vm8, %v927_v8, %v1363_v54  ;;  %v1659_v48 = vpop.f32.mrf.mxu3  ;;  %v1448_v28 = vpop.f32.mrf.mxu0 }
 0x1f5   : > { %2088 = vst.msk [vmem:[%s3252_s14 + $0xa0] sm:$0xff] %vm2067_vm9, %v1401_v58  ;;  %v3372_v46 = vadd.f32 %v1659_v48, %v1586_v43  ;;  %v1501_v34 = vadd.f32 %v1500_v62, %v1448_v28  ;;  %v1564_v47 = vpop.f32.mrf.mxu2  ;;  %v1505_v59 = vpop.f32.mrf.mxu1 }
 0x1f6   : > { %2384 = vmatmul.msk.bf16.gmra.mxu0 %vm542_vm1, %v3054_v45 }
 0x1f7   : > { %v1587_v61 = vadd.f32 %v1562_v41, %v1501_v34 }
 0x1f8   : > { %2402 = vmatmul.msk.bf16.gmra.mxu2 %vm542_vm1, %v2923_v49  ;;  %2393 = vmatmul.msk.bf16.gmra.mxu1 %vm542_vm1, %v2891_v60 }
 0x1f9   : > { %2411 = vmatmul.msk.bf16.gmra.mxu3 %vm542_vm1, %v3076_v53 }
 0x1fb   : > { %v1371_v29 = vpop.permute.xlu2 %1370 }
 0x1fc   : > { %v1405_v22 = vsel %vm1390_vm8, %v931_v31, %v1371_v29  ;;  %v1662_v10 = vpop.f32.mrf.mxu3  ;;  %v1450_v45 = vpop.f32.mrf.mxu0 }
 0x1fd   : > { %2096 = vst.msk [vmem:[%s3252_s14 + $0xe0] sm:$0xff] %vm2067_vm9, %v1405_v22  ;;  %v3387_v7 = vadd.f32 %v1662_v10, %v1587_v61  ;;  %v1503_v18 = vadd.f32 %v1502_v52, %v1450_v45  ;;  %v1567_v21 = vpop.f32.mrf.mxu2  ;;  %v1507_v50 = vpop.f32.mrf.mxu1 }
 0x1ff   : > { %v1588_v20 = vadd.f32 %v1564_v47, %v1503_v18 }
 0x203   : > { %v1367_v4 = vpop.permute.xlu0 %1366 }
 0x204   : > { %v1403_v60 = vsel %vm1390_vm8, %v929_v15, %v1367_v4  ;;  %v1664_v44 = vpop.f32.mrf.mxu3  ;;  %v1453_v19 = vpop.f32.mrf.mxu0 }
 0x205   : > { %2092 = vst.msk [vmem:[%s3252_s14 + $0xc0] sm:$0xff] %vm2067_vm9, %v1403_v60  ;;  %v3394_v55 = vadd.f32 %v1664_v44, %v1588_v20  ;;  %v1506_v16 = vadd.f32 %v1505_v59, %v1453_v19  ;;  %v1569_v13 = vpop.f32.mrf.mxu2  ;;  %v1510_v11 = vpop.f32.mrf.mxu1 }
 0x206   : > { %2385 = vmatmul.msk.bf16.gmra.mxu0 %vm542_vm1, %v3076_v53  ;;  %v1895_v53 = vrot.slane %v3212_v26, 5 }
 0x207   : > { %v1589_v25 = vadd.f32 %v1567_v21, %v1506_v16 }
 0x208   : > { %2403 = vmatmul.msk.bf16.gmra.mxu2 %vm542_vm1, %v3233_v5  ;;  %2394 = vmatmul.msk.bf16.gmra.mxu1 %vm542_vm1, %v2923_v49  ;;  %v1893_v5 = vsel %vm2930_vm7, %v2405_v2, %v1892_v33  ;;  %v1896_v49 = vsel %vm2930_vm7, %v1894_v40, %v1895_v53 }
 0x209   : > { %2412 = vmatmul.msk.bf16.gmra.mxu3 %vm542_vm1, %v3112_v3  ;;  %v1897_v26 = vunpack.c.l.b16 %v1893_v5  ;;  %v1898_v23 = vunpack.c.l.b16 %v1896_v49 }
 0x20b   : > { %v1369_v36 = vpop.permute.xlu1 %1368  ;;  %v1899_v54 = vpack.c.b16 %v1898_v23, %v1897_v26 }
 0x20c   : > { %v1404_v62 = vsel %vm1390_vm8, %v930_v38, %v1369_v36  ;;  %v1667_v30 = vpop.f32.mrf.mxu3  ;;  %v1455_v1 = vpop.f32.mrf.mxu0 }
 0x20d   : > { %2093 = vst.msk [vmem:[%s3252_s14 + $0xc8] sm:$0xff] %vm2067_vm9, %v1404_v62  ;;  %v3412_v39 = vadd.f32 %v1667_v30, %v1589_v25  ;;  %v1508_v63 = vadd.f32 %v1507_v50, %v1455_v1  ;;  %v1572_v51 = vpop.f32.mrf.mxu2  ;;  %v1512_v35 = vpop.f32.mrf.mxu1 }
 0x20f   : > { %v1590_v42 = vadd.f32 %v1569_v13, %v1508_v63 }
 0x214   : > { %v1669_v41 = vpop.f32.mrf.mxu3  ;;  %v1458_v43 = vpop.f32.mrf.mxu0 }
 0x215   : > { %v3418_v52 = vadd.f32 %v1669_v41, %v1590_v42  ;;  %v1511_v8 = vadd.f32 %v1510_v11, %v1458_v43  ;;  %v1574_v58 = vpop.f32.mrf.mxu2  ;;  %v1777_v28 = vpop.f32.mrf.mxu1 }
 0x216   : > { %2386 = vmatmul.msk.bf16.gmra.mxu0 %vm542_vm1, %v3112_v3 }
 0x217   : > { %v1591_v48 = vadd.f32 %v1572_v51, %v1511_v8 }
 0x219   : > { %2413 = vmatmul.msk.bf16.gmra.mxu3 %vm542_vm1, %v1899_v54 }
 0x21b   : > { %v1373_v34 = vpop.permute.xlu0 %1372 }
 0x21c   : > { %v1406_v47 = vsel %vm1390_vm8, %v932_v6, %v1373_v34  ;;  %v1672_v61 = vpop.f32.mrf.mxu3  ;;  %v1460_v59 = vpop.f32.mrf.mxu0 }
 0x21d   : > { %2097 = vst.msk [vmem:[%s3252_s14 + $0xe8] sm:$0xff] %vm2067_vm9, %v1406_v47  ;;  %v3428_v31 = vadd.f32 %v1672_v61, %v1591_v48  ;;  %v1513_v29 = vadd.f32 %v1512_v35, %v1460_v59  ;;  %v1831_v22 = vpop.f32.mrf.mxu2  ;;  %v1779_v3 = vpop.f32.mrf.mxu1 }
 0x21f   : > { %v1592_v10 = vadd.f32 %v1574_v58, %v1513_v29 }
 0x224   : > { %v1674_v45 = vpop.f32.mrf.mxu3  ;;  %v1725_v18 = vpop.f32.mrf.mxu0 }
 0x225   : > { %v3430_v21 = vadd.f32 %v1674_v45, %v1592_v10  ;;  %v1778_v20 = vadd.f32 %v1777_v28, %v1725_v18  ;;  %v1833_v50 = vpop.f32.mrf.mxu2  ;;  %v1782_v24 = vpop.f32.mrf.mxu1 }
 0x227   : > { %v1871_v15 = vadd.f32 %v1831_v22, %v1778_v20 }
 0x22c   : > { %v1915_v4 = vpop.f32.mrf.mxu3  ;;  %v1727_v60 = vpop.f32.mrf.mxu0 }
 0x22d   : > { %v1955_v44 = vadd.f32 %v1915_v4, %v1871_v15  ;;  %v1836_v19 = vpop.f32.mrf.mxu2  ;;  %v1780_v13 = vadd.f32 %v1779_v3, %v1727_v60  ;;  %v1784_v33 = vpop.f32.mrf.mxu1 }
 0x22f   : > { %v1971_v16 = vadd.f32 %v3137_v32, %v1955_v44  ;;  %v1872_v25 = vadd.f32 %v1833_v50, %v1780_v13 }
 0x231   : > { %2003 = vrot.lane.b32.xlu1 %v1971_v16, %s2515_s10 }
 0x234   : > { %v1917_v11 = vpop.f32.mrf.mxu3  ;;  %v1730_v38 = vpop.f32.mrf.mxu0 }
 0x235   : > { %v1956_v2 = vadd.f32 %v1917_v11, %v1872_v25  ;;  %v1783_v40 = vadd.f32 %v1782_v24, %v1730_v38  ;;  %v1838_v53 = vpop.f32.mrf.mxu2  ;;  %v1787_v62 = vpop.f32.mrf.mxu1 }
 0x237   : > { %v1972_v36 = vadd.f32 %v3137_v32, %v1956_v2  ;;  %v1873_v30 = vadd.f32 %v1836_v19, %v1783_v40 }
 0x239   : > { %2005 = vrot.lane.b32.xlu2 %v1972_v36, %s2515_s10 }
 0x23c   : > { %v1920_v1 = vpop.f32.mrf.mxu3  ;;  %v1732_v63 = vpop.f32.mrf.mxu0 }
 0x23d   : > { %v1957_v51 = vadd.f32 %v1920_v1, %v1873_v30  ;;  %v1841_v5 = vpop.f32.mrf.mxu2  ;;  %v1785_v42 = vadd.f32 %v1784_v33, %v1732_v63  ;;  %v1789_v35 = vpop.f32.mrf.mxu1 }
 0x23f   : > { %v1973_v49 = vadd.f32 %v3137_v32, %v1957_v51  ;;  %v1874_v26 = vadd.f32 %v1838_v53, %v1785_v42 }
 0x241   : > { %2007 = vrot.lane.b32.xlu0 %v1973_v49, %s2515_s10 }
 0x244   : > { %v1922_v23 = vpop.f32.mrf.mxu3  ;;  %v1735_v41 = vpop.f32.mrf.mxu0 }
 0x245   : > { %v1958_v43 = vadd.f32 %v1922_v23, %v1874_v26  ;;  %v1788_v8 = vadd.f32 %v1787_v62, %v1735_v41  ;;  %v1843_v54 = vpop.f32.mrf.mxu2  ;;  %v1792_v48 = vpop.f32.mrf.mxu1 }
 0x247   : > { %v1974_v58 = vadd.f32 %v3137_v32, %v1958_v43  ;;  %v1875_v28 = vadd.f32 %v1841_v5, %v1788_v8 }
 0x249   : > { %2009 = vrot.lane.b32.xlu1 %v1974_v58, %s2515_s10 }
 0x24c   : > { %v1925_v6 = vpop.f32.mrf.mxu3  ;;  %v1737_v34 = vpop.f32.mrf.mxu0 }
 0x24d   : > { %v1959_v47 = vadd.f32 %v1925_v6, %v1875_v28  ;;  %v1846_v61 = vpop.f32.mrf.mxu2  ;;  %v1790_v29 = vadd.f32 %v1789_v35, %v1737_v34  ;;  %v1794_v22 = vpop.f32.mrf.mxu1 }
 0x24f   : > { %v1975_v59 = vadd.f32 %v3137_v32, %v1959_v47  ;;  %v1876_v10 = vadd.f32 %v1843_v54, %v1790_v29 }
 0x251   : > { %2011 = vrot.lane.b32.xlu2 %v1975_v59, %s2515_s10 }
 0x254   : > { %v1927_v3 = vpop.f32.mrf.mxu3  ;;  %v1740_v45 = vpop.f32.mrf.mxu0 }
 0x255   : > { %v1960_v18 = vadd.f32 %v1927_v3, %v1876_v10  ;;  %v1793_v20 = vadd.f32 %v1792_v48, %v1740_v45  ;;  %v1848_v50 = vpop.f32.mrf.mxu2  ;;  %v1797_v15 = vpop.f32.mrf.mxu1 }
 0x257   : > { %v1976_v24 = vadd.f32 %v3137_v32, %v1960_v18  ;;  %v1877_v4 = vadd.f32 %v1846_v61, %v1793_v20 }
 0x259   : > { %2013 = vrot.lane.b32.xlu0 %v1976_v24, %s2515_s10 }
 0x25c   : > { %v1930_v60 = vpop.f32.mrf.mxu3  ;;  %v1742_v44 = vpop.f32.mrf.mxu0 }
 0x25d   : > { %v1961_v19 = vadd.f32 %v1930_v60, %v1877_v4  ;;  %v1851_v16 = vpop.f32.mrf.mxu2  ;;  %v1795_v33 = vadd.f32 %v1794_v22, %v1742_v44  ;;  %v1799_v25 = vpop.f32.mrf.mxu1 }
 0x25f   : > { %v1977_v13 = vadd.f32 %v3137_v32, %v1961_v19  ;;  %v1878_v11 = vadd.f32 %v1848_v50, %v1795_v33  ;;  %v3457_v50 = vld [vmem:[%s3567_s3] ss:$0 sm:$0xff] }
 0x260   : > { %v1694_v33 = vadd.f32 %v3457_v50, %v3287_v12 }
 0x261   : > { %2015 = vrot.lane.b32.xlu1 %v1977_v13, %s2515_s10 }
 0x264   : > { %v1932_v38 = vpop.f32.mrf.mxu3  ;;  %v1745_v2 = vpop.f32.mrf.mxu0 }
 0x265   : > { %v1962_v40 = vadd.f32 %v1932_v38, %v1878_v11  ;;  %v1798_v53 = vadd.f32 %v1797_v15, %v1745_v2  ;;  %v1853_v36 = vpop.f32.mrf.mxu2  ;;  %v1802_v1 = vpop.f32.mrf.mxu1 }
 0x267   : > { %v1978_v62 = vadd.f32 %v3137_v32, %v1962_v40  ;;  %v1879_v30 = vadd.f32 %v1851_v16, %v1798_v53 }
 0x269   : > { %2017 = vrot.lane.b32.xlu2 %v1978_v62, %s2515_s10 }
 0x26c   : > { %v1935_v63 = vpop.f32.mrf.mxu3  ;;  %v1747_v51 = vpop.f32.mrf.mxu0 }
 0x26d   : > { %v1963_v5 = vadd.f32 %v1935_v63, %v1879_v30  ;;  %v1800_v42 = vadd.f32 %v1799_v25, %v1747_v51  ;;  %v1856_v35 = vpop.f32.mrf.mxu2  ;;  %v1804_v54 = vpop.f32.mrf.mxu1 }
 0x26f   : > { %v1979_v49 = vadd.f32 %v3137_v32, %v1963_v5  ;;  %v1880_v26 = vadd.f32 %v1853_v36, %v1800_v42 }
 0x271   : > { %2019 = vrot.lane.b32.xlu0 %v1979_v49, %s2515_s10 }
 0x274   : > { %v1937_v23 = vpop.f32.mrf.mxu3  ;;  %v1750_v41 = vpop.f32.mrf.mxu0 }
 0x275   : > { %v1964_v43 = vadd.f32 %v1937_v23, %v1880_v26  ;;  %v1803_v8 = vadd.f32 %v1802_v1, %v1750_v41  ;;  %v1858_v48 = vpop.f32.mrf.mxu2  ;;  %v1807_v29 = vpop.f32.mrf.mxu1  ;;  %v1693_v26 = vadd.f32 %v3457_v50, %v3275_v27 }
 0x277   : > { %v1980_v58 = vadd.f32 %v3137_v32, %v1964_v43  ;;  %v1881_v28 = vadd.f32 %v1856_v35, %v1803_v8 }
 0x279   : > { %2021 = vrot.lane.b32.xlu1 %v1980_v58, %s2515_s10 }
 0x27c   : > { %v1940_v6 = vpop.f32.mrf.mxu3  ;;  %v1752_v34 = vpop.f32.mrf.mxu0 }
 0x27d   : > { %v1965_v47 = vadd.f32 %v1940_v6, %v1881_v28  ;;  %v1805_v59 = vadd.f32 %v1804_v54, %v1752_v34  ;;  %v1861_v22 = vpop.f32.mrf.mxu2  ;;  %v1809_v15 = vpop.f32.mrf.mxu1  ;;  %v1697_v28 = vadd.f32 %v3457_v50, %v3321_v0  ;;  %v1695_v34 = vadd.f32 %v3457_v50, %v3304_v17 }
 0x27f   : > { %v1981_v61 = vadd.f32 %v3137_v32, %v1965_v47  ;;  %v1882_v10 = vadd.f32 %v1858_v48, %v1805_v59  ;;  %v1696_v59 = vadd.f32 %v3457_v50, %v3306_v37 }
 0x281   : > { %2023 = vrot.lane.b32.xlu2 %v1981_v61, %s2515_s10 }
 0x284   : > { %v1942_v3 = vpop.f32.mrf.mxu3  ;;  %v1755_v45 = vpop.f32.mrf.mxu0 }
 0x285   : > { %v1966_v18 = vadd.f32 %v1942_v3, %v1882_v10  ;;  %v1808_v20 = vadd.f32 %v1807_v29, %v1755_v45  ;;  %v1863_v19 = vpop.f32.mrf.mxu2  ;;  %v1812_v25 = vpop.f32.mrf.mxu1  ;;  %v1698_v3 = vadd.f32 %v3457_v50, %v3328_v9 }
 0x287   : > { %v1982_v24 = vadd.f32 %v3457_v50, %v1966_v18  ;;  %v1883_v32 = vadd.f32 %v1861_v22, %v1808_v20  ;;  %v1700_v22 = vadd.f32 %v3457_v50, %v3350_v14  ;;  %v1699_v18 = vadd.f32 %v3457_v50, %v3343_v57 }
 0x289   : > { %2025 = vrot.lane.b32.xlu0 %v1982_v24, %s2515_s10  ;;  %v1703_v24 = vadd.f32 %v3457_v50, %v3387_v7 }
 0x28c   : > { %v1945_v4 = vpop.f32.mrf.mxu3  ;;  %v1757_v60 = vpop.f32.mrf.mxu0 }
 0x28d   : > { %v1967_v44 = vadd.f32 %v1945_v4, %v1883_v32  ;;  %v1810_v13 = vadd.f32 %v1809_v15, %v1757_v60  ;;  %v1866_v1 = vpop.f32.mrf.mxu2  ;;  %v1814_v49 = vpop.f32.mrf.mxu1  ;;  %v1701_v32 = vadd.f32 %v3457_v50, %v3365_v56  ;;  %v1702_v60 = vadd.f32 %v3457_v50, %v3372_v46 }
 0x28f   : > { %v1983_v16 = vadd.f32 %v3457_v50, %v1967_v44  ;;  %v1884_v38 = vadd.f32 %v1863_v19, %v1810_v13  ;;  %v1706_v19 = vadd.f32 %v3457_v50, %v3418_v52  ;;  %v1704_v13 = vadd.f32 %v3457_v50, %v3394_v55 }
 0x290   : > { %v1708_v55 = vadd.f32 %v3457_v50, %v3430_v21 }
 0x291   : > { %2027 = vrot.lane.b32.xlu1 %v1983_v16, %s2515_s10 }
 0x293   : > { %v2006_v11 = vpop.permute.xlu2 %2005 }
 0x294   : > { %v2052_v2 = vsel %vm1390_vm8, %v1694_v33, %v2006_v11  ;;  %v1947_v40 = vpop.f32.mrf.mxu3  ;;  %v1760_v53 = vpop.f32.mrf.mxu0 }
 0x295   : > { %2071 = vst.msk [vmem:[%s3252_s14 + $0x18] sm:$0xff] %vm2067_vm9, %v2052_v2  ;;  %v1968_v36 = vadd.f32 %v1947_v40, %v1884_v38  ;;  %v1813_v62 = vadd.f32 %v1812_v25, %v1760_v53  ;;  %v1868_v23 = vpop.f32.mrf.mxu2  ;;  %v1705_v25 = vadd.f32 %v3457_v50, %v3412_v39  ;;  %v1707_v38 = vadd.f32 %v3457_v50, %v3428_v31 }
 0x297   : > { %v1984_v30 = vadd.f32 %v3457_v50, %v1968_v36  ;;  %v1885_v63 = vadd.f32 %v1866_v1, %v1813_v62 }
 0x299   : > { %2029 = vrot.lane.b32.xlu2 %v1984_v30, %s2515_s10 }
 0x29c   : > { %v1950_v51 = vpop.f32.mrf.mxu3  ;;  %v1762_v12 = vpop.f32.mrf.mxu0 }
 0x29d   : > { %v1969_v5 = vadd.f32 %v1950_v51, %v1885_v63  ;;  %v1815_v35 = vadd.f32 %v1814_v49, %v1762_v12 }
 0x29f   : > { %v1985_v42 = vadd.f32 %v3457_v50, %v1969_v5  ;;  %v1886_v43 = vadd.f32 %v1868_v23, %v1815_v35 }
 0x2a1   : > { %2031 = vrot.lane.b32.xlu0 %v1985_v42, %s2515_s10 }
 0x2a3   : > { %v2004_v41 = vpop.permute.xlu1 %2003 }
 0x2a4   : > { %v2051_v8 = vsel %vm1390_vm8, %v1693_v26, %v2004_v41  ;;  %v1952_v54 = vpop.f32.mrf.mxu3 }
 0x2a5   : > { %2070 = vst.msk [vmem:[%s3252_s14 + $0x10] sm:$0xff] %vm2067_vm9, %v2051_v8  ;;  %v1970_v58 = vadd.f32 %v1952_v54, %v1886_v43 }
 0x2a7   : > { %v1986_v48 = vadd.f32 %v3457_v50, %v1970_v58 }
 0x2a9   : > { %2033 = vrot.lane.b32.xlu1 %v1986_v48, %s2515_s10 }
 0x2ab   : > { %v2012_v27 = vpop.permute.xlu2 %2011 }
 0x2ac   : > { %v2055_v6 = vsel %vm1390_vm8, %v1697_v28, %v2012_v27 }
 0x2ad   : > { %2078 = vst.msk [vmem:[%s3252_s14 + $0x50] sm:$0xff] %vm2067_vm9, %v2055_v6 }
 0x2b3   : > { %v2008_v47 = vpop.permute.xlu0 %2007 }
 0x2b4   : > { %v2053_v61 = vsel %vm1390_vm8, %v1695_v34, %v2008_v47 }
 0x2b5   : > { %2074 = vst.msk [vmem:[%s3252_s14 + $0x30] sm:$0xff] %vm2067_vm9, %v2053_v61 }
 0x2bb   : > { %v2010_v29 = vpop.permute.xlu1 %2009 }
 0x2bc   : > { %v2054_v0 = vsel %vm1390_vm8, %v1696_v59, %v2010_v29 }
 0x2bd   : > { %2075 = vst.msk [vmem:[%s3252_s14 + $0x38] sm:$0xff] %vm2067_vm9, %v2054_v0 }
 0x2c3   : > { %v2018_v10 = vpop.permute.xlu2 %2017 }
 0x2c4   : > { %v2058_v17 = vsel %vm1390_vm8, %v1700_v22, %v2018_v10 }
 0x2c5   : > { %2083 = vst.msk [vmem:[%s3252_s14 + $0x78] sm:$0xff] %vm2067_vm9, %v2058_v17 }
 0x2cb   : > { %v2014_v45 = vpop.permute.xlu0 %2013 }
 0x2cc   : > { %v2056_v37 = vsel %vm1390_vm8, %v1698_v3, %v2014_v45 }
 0x2cd   : > { %2079 = vst.msk [vmem:[%s3252_s14 + $0x58] sm:$0xff] %vm2067_vm9, %v2056_v37 }
 0x2d3   : > { %v2016_v20 = vpop.permute.xlu1 %2015 }
 0x2d4   : > { %v2057_v14 = vsel %vm1390_vm8, %v1699_v18, %v2016_v20 }
 0x2d5   : > { %2082 = vst.msk [vmem:[%s3252_s14 + $0x70] sm:$0xff] %vm2067_vm9, %v2057_v14 }
 0x2db   : > { %v2024_v15 = vpop.permute.xlu2 %2023 }
 0x2dc   : > { %v2061_v9 = vsel %vm1390_vm8, %v1703_v24, %v2024_v15 }
 0x2dd   : > { %2090 = vst.msk [vmem:[%s3252_s14 + $0xb0] sm:$0xff] %vm2067_vm9, %v2061_v9 }
 0x2e3   : > { %v2020_v4 = vpop.permute.xlu0 %2019 }
 0x2e4   : > { %v2059_v57 = vsel %vm1390_vm8, %v1701_v32, %v2020_v4 }
 0x2e5   : > { %2086 = vst.msk [vmem:[%s3252_s14 + $0x90] sm:$0xff] %vm2067_vm9, %v2059_v57 }
 0x2eb   : > { %v2022_v44 = vpop.permute.xlu1 %2021 }
 0x2ec   : > { %v2060_v7 = vsel %vm1390_vm8, %v1702_v60, %v2022_v44 }
 0x2ed   : > { %2087 = vst.msk [vmem:[%s3252_s14 + $0x98] sm:$0xff] %vm2067_vm9, %v2060_v7 }
 0x2f3   : > { %v2030_v16 = vpop.permute.xlu2 %2029 }
 0x2f4   : > { %v2064_v56 = vsel %vm1390_vm8, %v1706_v19, %v2030_v16 }
 0x2f5   : > { %2095 = vst.msk [vmem:[%s3252_s14 + $0xd8] sm:$0xff] %vm2067_vm9, %v2064_v56 }
 0x2fb   : > { %v2026_v33 = vpop.permute.xlu0 %2025 }
 0x2fc   : > { %v2062_v46 = vsel %vm1390_vm8, %v1704_v13, %v2026_v33 }
 0x2fd   : > { %2091 = vst.msk [vmem:[%s3252_s14 + $0xb8] sm:$0xff] %vm2067_vm9, %v2062_v46 }
 0x303   : > { %v2028_v11 = vpop.permute.xlu1 %2027 }
 0x304   : > { %v2063_v52 = vsel %vm1390_vm8, %v1705_v25, %v2028_v11 }
 0x305   : > { %2094 = vst.msk [vmem:[%s3252_s14 + $0xd0] sm:$0xff] %vm2067_vm9, %v2063_v52 }
 0x313   : > { %v2032_v2 = vpop.permute.xlu0 %2031 }
 0x314   : > { %v2065_v40 = vsel %vm1390_vm8, %v1707_v38, %v2032_v2 }
 0x315   : > { %2098 = vst.msk [vmem:[%s3252_s14 + $0xf0] sm:$0xff] %vm2067_vm9, %v2065_v40 }
 0x31b   : > { %v2034_v53 = vpop.permute.xlu1 %2033 }
 0x31c   : > { %v2066_v36 = vsel %vm1390_vm8, %v1708_v55, %v2034_v53 }
 0x31d   : > { %2099 = vst.msk [vmem:[%s3252_s14 + $0xf8] sm:$0xff] %vm2067_vm9, %v2066_v36 }
 0x31e PF: > { %s14_s19 = sadd.s32 1, %s2513_s19   ;;  %s3573_s15 = smov %s2505_s17 }
 0x31f   : > { %p11_p9 = scmp.ge.s32.totalorder %s14_s19, 14   ;;  %s3574_s16 = smov %s2509_s18 }
 0x320   : > { %s3575_s17 = smov %s3578_s20  ;;  %s3576_s18 = smov %s3582_s21 }
 0x321   :  { %13 = sbr.rel (!%p11_p9) target bundleno = 3 (0x3), region = 84 }

</bundles_post_ra>
